<compile_context>
chip_gen: v6e
topology: v6e:2x2x1
jax: 0.10.0
libtpu: 0.0.40
codegen_flags: <defaults>
</compile_context>

<pallas_src>
import functools

import jax
import jax.numpy as jnp
from jax.experimental import pallas as pl
from jax.experimental.pallas import tpu as pltpu

# ---------------------------------------------------------------------------
# Model hyper-parameters (small, consistent with the PyTorch module)
# ---------------------------------------------------------------------------
NUM_ITEMS = 20
NUM_SKILLS = 10
HID_SIZE = 32          # hid_size
EMBED_SIZE = 32        # embed_size (item/skill embeddings are embed_size // 2)
NUM_HID_LAYERS = 2     # num_hid_layers
DROP_PROB = 0.0        # dropout is identity at inference anyway

B = 2                  # batch
T = 8                  # sequence length


# ---------------------------------------------------------------------------
# Pallas kernel: multi-layer LSTM recurrence + batched lin1 -> relu -> lin2
# ---------------------------------------------------------------------------
def dkt_kernel(x_ref, q_ref, *refs, T, B, H, E, L):
    """Inputs (all VMEM; weights pre-transposed / gate-reordered by wrapper):
      x_ref: (T*B, 2E)  time-major flattened LSTM inputs
      q_ref: (T*B, E)   time-major flattened query
      refs = [w_ih0 (2E,4H), w_hh0 (H,4H), b0 (1,4H),
              {w_cat_l (2H,4H), b_l (1,4H)}  for l = 1..L-1,
              lin1_wh (H,H), lin1_wq (E,H), lin1_b (1,H),
              lin2_w (1,H), lin2_b (1,1),
              out_ref (T*B, 1)]
    Gate columns are pre-reordered to [i, f, o, g].
    """
    # ---- hoist all weight/bias loads out of the time loop ----
    idx = 0
    w_ih0 = refs[idx][...]; idx += 1
    w_hh0 = refs[idx][...]; idx += 1
    b0 = refs[idx][...]; idx += 1
    layer_w = []
    layer_b = []
    for _ in range(L - 1):
        layer_w.append(refs[idx][...]); idx += 1
        # pre-broadcast the bias to (B, 4H) once (JAX does not CSE broadcasts)
        layer_b.append(jnp.broadcast_to(refs[idx][...], (B, 4 * H))); idx += 1
    lin1_wh = refs[idx][...]; idx += 1
    lin1_wq = refs[idx][...]; idx += 1
    lin1_b = refs[idx][...]; idx += 1
    lin2_w = refs[idx][...]; idx += 1    # (1, H) row
    lin2_b = refs[idx][...]; idx += 1    # (1, 1)
    out_ref = refs[idx]

    # ---- layer-0 input projection for ALL timesteps: one well-shaped matmul
    #      (bias folded in) off the serial critical path.
    gx0 = jnp.dot(x_ref[...], w_ih0,
                  preferred_element_type=jnp.float32) + b0          # (T*B, 4H)

    def lstm_cell(gates, c_prev):
        # reordered gate layout: [ i | f | o | g ]
        sg = jax.nn.sigmoid(gates[:, :3 * H])    # one contiguous EUP slab (i,f,o)
        g_g = jnp.tanh(gates[:, 3 * H:])
        i_g = sg[:, :H]
        f_g = sg[:, H:2 * H]
        o_g = sg[:, 2 * H:3 * H]
        c_new = f_g * c_prev + i_g * g_g
        h_new = o_g * jnp.tanh(c_new)
        return h_new, c_new

    h = [jnp.zeros((B, H), jnp.float32) for _ in range(L)]
    c = [jnp.zeros((B, H), jnp.float32) for _ in range(L)]
    h_top = []
    # T is small & static: full unroll lets the scheduler wavefront layer-0 of
    # step t+1 with layer-1 of step t, hiding MXU/EUP result latency.
    for t in range(T):
        gates0 = gx0[t * B:(t + 1) * B] + jnp.dot(
            h[0], w_hh0, preferred_element_type=jnp.float32)
        h[0], c[0] = lstm_cell(gates0, c[0])
        inp = h[0]
        for l in range(1, L):
            # fused single dot: [inp, h_prev] @ [w_ih; w_hh]
            cat_in = jnp.concatenate([inp, h[l]], axis=-1)           # (B, 2H)
            gates = jnp.dot(cat_in, layer_w[l - 1],
                            preferred_element_type=jnp.float32) + layer_b[l - 1]
            h[l], c[l] = lstm_cell(gates, c[l])
            inp = h[l]
        h_top.append(inp)

    # ---- batched head (out of the recurrence):
    #      lin1 split into h-part + q-part (no per-step lane concat),
    #      relu, then lin2 as VPU multiply + lane reduction (no N=1 MXU dot),
    #      and a single dense store.
    h_all = jnp.concatenate(h_top, axis=0)                           # (T*B, H)
    z = (jnp.dot(h_all, lin1_wh, preferred_element_type=jnp.float32)
         + jnp.dot(q_ref[...], lin1_wq, preferred_element_type=jnp.float32)
         + lin1_b)
    z = jnp.maximum(z, 0.0)                  # relu (dropout == identity at eval)
    y = jnp.sum(z * lin2_w, axis=-1, keepdims=True) + lin2_b          # (T*B, 1)
    out_ref[...] = y


# ---------------------------------------------------------------------------
# Wrapper glue: embeddings, feature build, weight re-packing + pallas_call
# ---------------------------------------------------------------------------
def build_features(params, item_inputs, skill_inputs, label_inputs,
                   item_ids, skill_ids):
    item_e = jnp.take(params["item_emb"], item_inputs, axis=0)      # (B,T,E/2)
    skill_e = jnp.take(params["skill_emb"], skill_inputs, axis=0)   # (B,T,E/2)
    lab = label_inputs[..., None].astype(jnp.float32)               # (B,T,1)
    half = jnp.concatenate([item_e, skill_e], axis=-1)              # (B,T,E)
    # first E dims scaled by label, second E dims by (1 - label)
    inputs = jnp.concatenate([half * lab, half * (1.0 - lab)], axis=-1)  # (B,T,2E)

    q_item = jnp.take(params["item_emb"], item_ids, axis=0)
    q_skill = jnp.take(params["skill_emb"], skill_ids, axis=0)
    query = jnp.concatenate([q_item, q_skill], axis=-1)             # (B,T,E)
    return inputs.astype(jnp.float32), query.astype(jnp.float32)


def _reorder_gate_cols(w, H):
    # PyTorch LSTM gate order [i, f, g, o] -> kernel order [i, f, o, g]
    i = w[..., 0:H]
    f = w[..., H:2 * H]
    g = w[..., 2 * H:3 * H]
    o = w[..., 3 * H:4 * H]
    return jnp.concatenate([i, f, o, g], axis=-1)


@jax.jit
def dkt_forward(params, item_inputs, skill_inputs, label_inputs,
                item_ids, skill_ids):
    H, E, L = HID_SIZE, EMBED_SIZE, NUM_HID_LAYERS
    inputs, query = build_features(params, item_inputs, skill_inputs,
                                   label_inputs, item_ids, skill_ids)
    b, t, _ = inputs.shape
    # time-major, flattened to (T*B, .) so the kernel can do batched matmuls
    x_tm = jnp.transpose(inputs, (1, 0, 2)).reshape(t * b, 2 * E)
    q_tm = jnp.transpose(query, (1, 0, 2)).reshape(t * b, E)

    args = [x_tm, q_tm,
            _reorder_gate_cols(params["w_ih_0"], H),
            _reorder_gate_cols(params["w_hh_0"], H),
            _reorder_gate_cols(params["b_0"], H)]
    for l in range(1, L):
        w_cat = jnp.concatenate([params[f"w_ih_{l}"], params[f"w_hh_{l}"]],
                                axis=0)                              # (2H, 4H)
        args.append(_reorder_gate_cols(w_cat, H))
        args.append(_reorder_gate_cols(params[f"b_{l}"], H))
    args += [params["lin1_w"][:H],          # (H, H): multiplies LSTM output
             params["lin1_w"][H:],          # (E, H): multiplies query
             params["lin1_b"],              # (1, H)
             params["lin2_w"].T,            # (1, H)
             params["lin2_b"]]              # (1, 1)

    kernel = functools.partial(dkt_kernel, T=t, B=b, H=H, E=E, L=L)
    out = pl.pallas_call(
        kernel,
        out_shape=jax.ShapeDtypeStruct((t * b, 1), jnp.float32),
        in_specs=[pl.BlockSpec(memory_space=pltpu.MemorySpace.VMEM)] * len(args),
        out_specs=pl.BlockSpec(memory_space=pltpu.MemorySpace.VMEM),
    )(*args)

    # rows are ordered time-major (t*B + b); back to batch-first (B, T)
    return jnp.transpose(out.reshape(t, b), (1, 0))


# ---------------------------------------------------------------------------
# Pure-JAX reference (same math, PyTorch param layout) for verification
# ---------------------------------------------------------------------------
def dkt_reference(params, item_inputs, skill_inputs, label_inputs,
                  item_ids, skill_ids):
    H, L = HID_SIZE, NUM_HID_LAYERS
    inputs, query = build_features(params, item_inputs, skill_inputs,
                                   label_inputs, item_ids, skill_ids)
    b, t, _ = inputs.shape
    layer_in = inputs
    for l in range(L):
        w_ih = params[f"w_ih_{l}"]
        w_hh = params[f"w_hh_{l}"]
        bias = params[f"b_{l}"][0]
        h = jnp.zeros((b, H), jnp.float32)
        c = jnp.zeros((b, H), jnp.float32)
        outs = []
        for s in range(t):
            x_t = layer_in[:, s]
            gates = x_t @ w_ih + h @ w_hh + bias
            i_g = jax.nn.sigmoid(gates[:, :H])
            f_g = jax.nn.sigmoid(gates[:, H:2 * H])
            g_g = jnp.tanh(gates[:, 2 * H:3 * H])
            o_g = jax.nn.sigmoid(gates[:, 3 * H:])
            c = f_g * c + i_g * g_g
            h = o_g * jnp.tanh(c)
            outs.append(h)
        layer_in = jnp.stack(outs, axis=1)
    cat = jnp.concatenate([layer_in, query], axis=-1)
    z = jnp.maximum(cat @ params["lin1_w"] + params["lin1_b"][0], 0.0)
    y = z @ params["lin2_w"] + params["lin2_b"][0]
    return y[..., 0]


# ---------------------------------------------------------------------------
# Deterministic parameter init (no checkpoint loading)
# ---------------------------------------------------------------------------
def init_params(key):
    H, E, L = HID_SIZE, EMBED_SIZE, NUM_HID_LAYERS
    ks = jax.random.split(key, 8 + 3 * L)

    def init(k, shape, scale=0.1):
        return jax.random.normal(k, shape, jnp.float32) * scale

    params = {
        # padding_idx=0 -> row 0 is zero
        "item_emb": init(ks[0], (NUM_ITEMS + 1, E // 2)).at[0].set(0.0),
        "skill_emb": init(ks[1], (NUM_SKILLS + 1, E // 2)).at[0].set(0.0),
        "lin1_w": init(ks[2], (H + E, H)),
        "lin1_b": init(ks[3], (1, H)),
        "lin2_w": init(ks[4], (H, 1)),
        "lin2_b": init(ks[5], (1, 1)),
    }
    for l in range(L):
        in_dim = 2 * E if l == 0 else H
        params[f"w_ih_{l}"] = init(ks[6 + 3 * l], (in_dim, 4 * H))
        params[f"w_hh_{l}"] = init(ks[7 + 3 * l], (H, 4 * H))
        # combined bias (bias_ih + bias_hh)
        params[f"b_{l}"] = init(ks[8 + 3 * l], (1, 4 * H))
    return params


if __name__ == "__main__":
    key = jax.random.PRNGKey(0)
    k_params, k1, k2, k3, k4, k5 = jax.random.split(key, 6)
    params = init_params(k_params)

    item_inputs = jax.random.randint(k1, (B, T), 0, NUM_ITEMS + 1)
    skill_inputs = jax.random.randint(k2, (B, T), 0, NUM_SKILLS + 1)
    label_inputs = jax.random.randint(k3, (B, T), 0, 2)
    item_ids = jax.random.randint(k4, (B, T), 0, NUM_ITEMS + 1)
    skill_ids = jax.random.randint(k5, (B, T), 0, NUM_SKILLS + 1)

    out = dkt_forward(params, item_inputs, skill_inputs, label_inputs,
                      item_ids, skill_ids)
    out = jax.block_until_ready(out)

    ref = dkt_reference(params, item_inputs, skill_inputs, label_inputs,
                        item_ids, skill_ids)
    ref = jax.block_until_ready(ref)

    assert out.shape == (B, T), out.shape
    assert jnp.allclose(out, ref, atol=1e-4, rtol=1e-4), (
        f"max abs diff: {jnp.max(jnp.abs(out - ref))}")

    print("KERNEL_OK")
</pallas_src>

<mosaic_0001>
module attributes {stable_mosaic.version = 11 : i64} {
  func.func @dkt_kernel(%arg0: memref<16x64xf32, #tpu.memory_space<vmem>>, %arg1: memref<16x32xf32, #tpu.memory_space<vmem>>, %arg2: memref<64x128xf32, #tpu.memory_space<vmem>>, %arg3: memref<32x128xf32, #tpu.memory_space<vmem>>, %arg4: memref<1x128xf32, #tpu.memory_space<vmem>>, %arg5: memref<64x128xf32, #tpu.memory_space<vmem>>, %arg6: memref<1x128xf32, #tpu.memory_space<vmem>>, %arg7: memref<32x32xf32, #tpu.memory_space<vmem>>, %arg8: memref<32x32xf32, #tpu.memory_space<vmem>>, %arg9: memref<1x32xf32, #tpu.memory_space<vmem>>, %arg10: memref<1x32xf32, #tpu.memory_space<vmem>>, %arg11: memref<1x1xf32, #tpu.memory_space<vmem>>, %arg12: memref<16x1xf32, #tpu.memory_space<vmem>>) attributes {dimension_semantics = [], scalar_prefetch = 0 : i64, scratch_operands = 0 : i64, tpu.core_type = #tpu.core_type<tc>} {
    %c0 = arith.constant 0 : index
    %c0_0 = arith.constant 0 : index
    %0 = vector.load %arg2[%c0, %c0_0] : memref<64x128xf32, #tpu.memory_space<vmem>>, vector<64x128xf32>
    %c0_1 = arith.constant 0 : index
    %c0_2 = arith.constant 0 : index
    %1 = vector.load %arg3[%c0_1, %c0_2] : memref<32x128xf32, #tpu.memory_space<vmem>>, vector<32x128xf32>
    %c0_3 = arith.constant 0 : index
    %c0_4 = arith.constant 0 : index
    %2 = vector.load %arg4[%c0_3, %c0_4] : memref<1x128xf32, #tpu.memory_space<vmem>>, vector<1x128xf32>
    %c0_5 = arith.constant 0 : index
    %c0_6 = arith.constant 0 : index
    %3 = vector.load %arg5[%c0_5, %c0_6] : memref<64x128xf32, #tpu.memory_space<vmem>>, vector<64x128xf32>
    %c0_7 = arith.constant 0 : index
    %c0_8 = arith.constant 0 : index
    %4 = vector.load %arg6[%c0_7, %c0_8] : memref<1x128xf32, #tpu.memory_space<vmem>>, vector<1x128xf32>
    %5 = vector.shape_cast %4 : vector<1x128xf32> to vector<1x128xf32>
    %6 = vector.broadcast %5 : vector<1x128xf32> to vector<2x128xf32>
    %c0_9 = arith.constant 0 : index
    %c0_10 = arith.constant 0 : index
    %7 = vector.load %arg7[%c0_9, %c0_10] : memref<32x32xf32, #tpu.memory_space<vmem>>, vector<32x32xf32>
    %c0_11 = arith.constant 0 : index
    %c0_12 = arith.constant 0 : index
    %8 = vector.load %arg8[%c0_11, %c0_12] : memref<32x32xf32, #tpu.memory_space<vmem>>, vector<32x32xf32>
    %c0_13 = arith.constant 0 : index
    %c0_14 = arith.constant 0 : index
    %9 = vector.load %arg9[%c0_13, %c0_14] : memref<1x32xf32, #tpu.memory_space<vmem>>, vector<1x32xf32>
    %c0_15 = arith.constant 0 : index
    %c0_16 = arith.constant 0 : index
    %10 = vector.load %arg10[%c0_15, %c0_16] : memref<1x32xf32, #tpu.memory_space<vmem>>, vector<1x32xf32>
    %c0_17 = arith.constant 0 : index
    %c0_18 = arith.constant 0 : index
    %11 = vector.load %arg11[%c0_17, %c0_18] : memref<1x1xf32, #tpu.memory_space<vmem>>, vector<1x1xf32>
    %c0_19 = arith.constant 0 : index
    %c0_20 = arith.constant 0 : index
    %12 = vector.load %arg0[%c0_19, %c0_20] : memref<16x64xf32, #tpu.memory_space<vmem>>, vector<16x64xf32>
    %cst = arith.constant dense<0.000000e+00> : vector<16x128xf32>
    %13 = tpu.matmul %12, %0, %cst {dimension_numbers = #tpu.dot_dimension_numbers<[1], [0], [0], [1], [0, 0, 1, 1], [], []>} : vector<16x64xf32>, vector<64x128xf32>, vector<16x128xf32> -> vector<16x128xf32>
    %14 = vector.broadcast %2 : vector<1x128xf32> to vector<16x128xf32>
    %15 = arith.addf %13, %14 : vector<16x128xf32>
    %cst_21 = arith.constant 0.000000e+00 : f32
    %16 = vector.broadcast %cst_21 : f32 to vector<2x32xf32>
    %cst_22 = arith.constant 0.000000e+00 : f32
    %17 = vector.broadcast %cst_22 : f32 to vector<2x32xf32>
    %cst_23 = arith.constant 0.000000e+00 : f32
    %18 = vector.broadcast %cst_23 : f32 to vector<2x32xf32>
    %cst_24 = arith.constant 0.000000e+00 : f32
    %19 = vector.broadcast %cst_24 : f32 to vector<2x32xf32>
    %20 = vector.extract_strided_slice %15 {offsets = [0, 0], sizes = [2, 128], strides = [1, 1]} : vector<16x128xf32> to vector<2x128xf32>
    %cst_25 = arith.constant dense<0.000000e+00> : vector<2x128xf32>
    %21 = tpu.matmul %16, %1, %cst_25 {dimension_numbers = #tpu.dot_dimension_numbers<[1], [0], [0], [1], [0, 0, 1, 1], [], []>} : vector<2x32xf32>, vector<32x128xf32>, vector<2x128xf32> -> vector<2x128xf32>
    %22 = arith.addf %20, %21 : vector<2x128xf32>
    %23 = vector.extract_strided_slice %22 {offsets = [0, 0], sizes = [2, 96], strides = [1, 1]} : vector<2x128xf32> to vector<2x96xf32>
    %24 = arith.negf %23 : vector<2x96xf32>
    %25 = math.exp %24 : vector<2x96xf32>
    %cst_26 = arith.constant 1.000000e+00 : f32
    %26 = vector.broadcast %cst_26 : f32 to vector<2x96xf32>
    %27 = arith.addf %26, %25 : vector<2x96xf32>
    %28 = arith.divf %26, %27 : vector<2x96xf32>
    %29 = vector.extract_strided_slice %22 {offsets = [0, 96], sizes = [2, 32], strides = [1, 1]} : vector<2x128xf32> to vector<2x32xf32>
    %30 = math.tanh %29 : vector<2x32xf32>
    %31 = vector.extract_strided_slice %28 {offsets = [0, 0], sizes = [2, 32], strides = [1, 1]} : vector<2x96xf32> to vector<2x32xf32>
    %32 = vector.extract_strided_slice %28 {offsets = [0, 32], sizes = [2, 32], strides = [1, 1]} : vector<2x96xf32> to vector<2x32xf32>
    %33 = vector.extract_strided_slice %28 {offsets = [0, 64], sizes = [2, 32], strides = [1, 1]} : vector<2x96xf32> to vector<2x32xf32>
    %34 = arith.mulf %32, %18 : vector<2x32xf32>
    %35 = arith.mulf %31, %30 : vector<2x32xf32>
    %36 = arith.addf %34, %35 : vector<2x32xf32>
    %37 = math.tanh %36 : vector<2x32xf32>
    %38 = arith.mulf %33, %37 : vector<2x32xf32>
    %39 = tpu.concatenate %38, %17 in 1 : vector<2x32xf32>, vector<2x32xf32> -> vector<2x64xf32>
    %cst_27 = arith.constant dense<0.000000e+00> : vector<2x128xf32>
    %40 = tpu.matmul %39, %3, %cst_27 {dimension_numbers = #tpu.dot_dimension_numbers<[1], [0], [0], [1], [0, 0, 1, 1], [], []>} : vector<2x64xf32>, vector<64x128xf32>, vector<2x128xf32> -> vector<2x128xf32>
    %41 = arith.addf %40, %6 : vector<2x128xf32>
    %42 = vector.extract_strided_slice %41 {offsets = [0, 0], sizes = [2, 96], strides = [1, 1]} : vector<2x128xf32> to vector<2x96xf32>
    %43 = arith.negf %42 : vector<2x96xf32>
    %44 = math.exp %43 : vector<2x96xf32>
    %cst_28 = arith.constant 1.000000e+00 : f32
    %45 = vector.broadcast %cst_28 : f32 to vector<2x96xf32>
    %46 = arith.addf %45, %44 : vector<2x96xf32>
    %47 = arith.divf %45, %46 : vector<2x96xf32>
    %48 = vector.extract_strided_slice %41 {offsets = [0, 96], sizes = [2, 32], strides = [1, 1]} : vector<2x128xf32> to vector<2x32xf32>
    %49 = math.tanh %48 : vector<2x32xf32>
    %50 = vector.extract_strided_slice %47 {offsets = [0, 0], sizes = [2, 32], strides = [1, 1]} : vector<2x96xf32> to vector<2x32xf32>
    %51 = vector.extract_strided_slice %47 {offsets = [0, 32], sizes = [2, 32], strides = [1, 1]} : vector<2x96xf32> to vector<2x32xf32>
    %52 = vector.extract_strided_slice %47 {offsets = [0, 64], sizes = [2, 32], strides = [1, 1]} : vector<2x96xf32> to vector<2x32xf32>
    %53 = arith.mulf %51, %19 : vector<2x32xf32>
    %54 = arith.mulf %50, %49 : vector<2x32xf32>
    %55 = arith.addf %53, %54 : vector<2x32xf32>
    %56 = math.tanh %55 : vector<2x32xf32>
    %57 = arith.mulf %52, %56 : vector<2x32xf32>
    %58 = vector.extract_strided_slice %15 {offsets = [2, 0], sizes = [2, 128], strides = [1, 1]} : vector<16x128xf32> to vector<2x128xf32>
    %cst_29 = arith.constant dense<0.000000e+00> : vector<2x128xf32>
    %59 = tpu.matmul %38, %1, %cst_29 {dimension_numbers = #tpu.dot_dimension_numbers<[1], [0], [0], [1], [0, 0, 1, 1], [], []>} : vector<2x32xf32>, vector<32x128xf32>, vector<2x128xf32> -> vector<2x128xf32>
    %60 = arith.addf %58, %59 : vector<2x128xf32>
    %61 = vector.extract_strided_slice %60 {offsets = [0, 0], sizes = [2, 96], strides = [1, 1]} : vector<2x128xf32> to vector<2x96xf32>
    %62 = arith.negf %61 : vector<2x96xf32>
    %63 = math.exp %62 : vector<2x96xf32>
    %cst_30 = arith.constant 1.000000e+00 : f32
    %64 = vector.broadcast %cst_30 : f32 to vector<2x96xf32>
    %65 = arith.addf %64, %63 : vector<2x96xf32>
    %66 = arith.divf %64, %65 : vector<2x96xf32>
    %67 = vector.extract_strided_slice %60 {offsets = [0, 96], sizes = [2, 32], strides = [1, 1]} : vector<2x128xf32> to vector<2x32xf32>
    %68 = math.tanh %67 : vector<2x32xf32>
    %69 = vector.extract_strided_slice %66 {offsets = [0, 0], sizes = [2, 32], strides = [1, 1]} : vector<2x96xf32> to vector<2x32xf32>
    %70 = vector.extract_strided_slice %66 {offsets = [0, 32], sizes = [2, 32], strides = [1, 1]} : vector<2x96xf32> to vector<2x32xf32>
    %71 = vector.extract_strided_slice %66 {offsets = [0, 64], sizes = [2, 32], strides = [1, 1]} : vector<2x96xf32> to vector<2x32xf32>
    %72 = arith.mulf %70, %36 : vector<2x32xf32>
    %73 = arith.mulf %69, %68 : vector<2x32xf32>
    %74 = arith.addf %72, %73 : vector<2x32xf32>
    %75 = math.tanh %74 : vector<2x32xf32>
    %76 = arith.mulf %71, %75 : vector<2x32xf32>
    %77 = tpu.concatenate %76, %57 in 1 : vector<2x32xf32>, vector<2x32xf32> -> vector<2x64xf32>
    %cst_31 = arith.constant dense<0.000000e+00> : vector<2x128xf32>
    %78 = tpu.matmul %77, %3, %cst_31 {dimension_numbers = #tpu.dot_dimension_numbers<[1], [0], [0], [1], [0, 0, 1, 1], [], []>} : vector<2x64xf32>, vector<64x128xf32>, vector<2x128xf32> -> vector<2x128xf32>
    %79 = arith.addf %78, %6 : vector<2x128xf32>
    %80 = vector.extract_strided_slice %79 {offsets = [0, 0], sizes = [2, 96], strides = [1, 1]} : vector<2x128xf32> to vector<2x96xf32>
    %81 = arith.negf %80 : vector<2x96xf32>
    %82 = math.exp %81 : vector<2x96xf32>
    %cst_32 = arith.constant 1.000000e+00 : f32
    %83 = vector.broadcast %cst_32 : f32 to vector<2x96xf32>
    %84 = arith.addf %83, %82 : vector<2x96xf32>
    %85 = arith.divf %83, %84 : vector<2x96xf32>
    %86 = vector.extract_strided_slice %79 {offsets = [0, 96], sizes = [2, 32], strides = [1, 1]} : vector<2x128xf32> to vector<2x32xf32>
    %87 = math.tanh %86 : vector<2x32xf32>
    %88 = vector.extract_strided_slice %85 {offsets = [0, 0], sizes = [2, 32], strides = [1, 1]} : vector<2x96xf32> to vector<2x32xf32>
    %89 = vector.extract_strided_slice %85 {offsets = [0, 32], sizes = [2, 32], strides = [1, 1]} : vector<2x96xf32> to vector<2x32xf32>
    %90 = vector.extract_strided_slice %85 {offsets = [0, 64], sizes = [2, 32], strides = [1, 1]} : vector<2x96xf32> to vector<2x32xf32>
    %91 = arith.mulf %89, %55 : vector<2x32xf32>
    %92 = arith.mulf %88, %87 : vector<2x32xf32>
    %93 = arith.addf %91, %92 : vector<2x32xf32>
    %94 = math.tanh %93 : vector<2x32xf32>
    %95 = arith.mulf %90, %94 : vector<2x32xf32>
    %96 = vector.extract_strided_slice %15 {offsets = [4, 0], sizes = [2, 128], strides = [1, 1]} : vector<16x128xf32> to vector<2x128xf32>
    %cst_33 = arith.constant dense<0.000000e+00> : vector<2x128xf32>
    %97 = tpu.matmul %76, %1, %cst_33 {dimension_numbers = #tpu.dot_dimension_numbers<[1], [0], [0], [1], [0, 0, 1, 1], [], []>} : vector<2x32xf32>, vector<32x128xf32>, vector<2x128xf32> -> vector<2x128xf32>
    %98 = arith.addf %96, %97 : vector<2x128xf32>
    %99 = vector.extract_strided_slice %98 {offsets = [0, 0], sizes = [2, 96], strides = [1, 1]} : vector<2x128xf32> to vector<2x96xf32>
    %100 = arith.negf %99 : vector<2x96xf32>
    %101 = math.exp %100 : vector<2x96xf32>
    %cst_34 = arith.constant 1.000000e+00 : f32
    %102 = vector.broadcast %cst_34 : f32 to vector<2x96xf32>
    %103 = arith.addf %102, %101 : vector<2x96xf32>
    %104 = arith.divf %102, %103 : vector<2x96xf32>
    %105 = vector.extract_strided_slice %98 {offsets = [0, 96], sizes = [2, 32], strides = [1, 1]} : vector<2x128xf32> to vector<2x32xf32>
    %106 = math.tanh %105 : vector<2x32xf32>
    %107 = vector.extract_strided_slice %104 {offsets = [0, 0], sizes = [2, 32], strides = [1, 1]} : vector<2x96xf32> to vector<2x32xf32>
    %108 = vector.extract_strided_slice %104 {offsets = [0, 32], sizes = [2, 32], strides = [1, 1]} : vector<2x96xf32> to vector<2x32xf32>
    %109 = vector.extract_strided_slice %104 {offsets = [0, 64], sizes = [2, 32], strides = [1, 1]} : vector<2x96xf32> to vector<2x32xf32>
    %110 = arith.mulf %108, %74 : vector<2x32xf32>
    %111 = arith.mulf %107, %106 : vector<2x32xf32>
    %112 = arith.addf %110, %111 : vector<2x32xf32>
    %113 = math.tanh %112 : vector<2x32xf32>
    %114 = arith.mulf %109, %113 : vector<2x32xf32>
    %115 = tpu.concatenate %114, %95 in 1 : vector<2x32xf32>, vector<2x32xf32> -> vector<2x64xf32>
    %cst_35 = arith.constant dense<0.000000e+00> : vector<2x128xf32>
    %116 = tpu.matmul %115, %3, %cst_35 {dimension_numbers = #tpu.dot_dimension_numbers<[1], [0], [0], [1], [0, 0, 1, 1], [], []>} : vector<2x64xf32>, vector<64x128xf32>, vector<2x128xf32> -> vector<2x128xf32>
    %117 = arith.addf %116, %6 : vector<2x128xf32>
    %118 = vector.extract_strided_slice %117 {offsets = [0, 0], sizes = [2, 96], strides = [1, 1]} : vector<2x128xf32> to vector<2x96xf32>
    %119 = arith.negf %118 : vector<2x96xf32>
    %120 = math.exp %119 : vector<2x96xf32>
    %cst_36 = arith.constant 1.000000e+00 : f32
    %121 = vector.broadcast %cst_36 : f32 to vector<2x96xf32>
    %122 = arith.addf %121, %120 : vector<2x96xf32>
    %123 = arith.divf %121, %122 : vector<2x96xf32>
    %124 = vector.extract_strided_slice %117 {offsets = [0, 96], sizes = [2, 32], strides = [1, 1]} : vector<2x128xf32> to vector<2x32xf32>
    %125 = math.tanh %124 : vector<2x32xf32>
    %126 = vector.extract_strided_slice %123 {offsets = [0, 0], sizes = [2, 32], strides = [1, 1]} : vector<2x96xf32> to vector<2x32xf32>
    %127 = vector.extract_strided_slice %123 {offsets = [0, 32], sizes = [2, 32], strides = [1, 1]} : vector<2x96xf32> to vector<2x32xf32>
    %128 = vector.extract_strided_slice %123 {offsets = [0, 64], sizes = [2, 32], strides = [1, 1]} : vector<2x96xf32> to vector<2x32xf32>
    %129 = arith.mulf %127, %93 : vector<2x32xf32>
    %130 = arith.mulf %126, %125 : vector<2x32xf32>
    %131 = arith.addf %129, %130 : vector<2x32xf32>
    %132 = math.tanh %131 : vector<2x32xf32>
    %133 = arith.mulf %128, %132 : vector<2x32xf32>
    %134 = vector.extract_strided_slice %15 {offsets = [6, 0], sizes = [2, 128], strides = [1, 1]} : vector<16x128xf32> to vector<2x128xf32>
    %cst_37 = arith.constant dense<0.000000e+00> : vector<2x128xf32>
    %135 = tpu.matmul %114, %1, %cst_37 {dimension_numbers = #tpu.dot_dimension_numbers<[1], [0], [0], [1], [0, 0, 1, 1], [], []>} : vector<2x32xf32>, vector<32x128xf32>, vector<2x128xf32> -> vector<2x128xf32>
    %136 = arith.addf %134, %135 : vector<2x128xf32>
    %137 = vector.extract_strided_slice %136 {offsets = [0, 0], sizes = [2, 96], strides = [1, 1]} : vector<2x128xf32> to vector<2x96xf32>
    %138 = arith.negf %137 : vector<2x96xf32>
    %139 = math.exp %138 : vector<2x96xf32>
    %cst_38 = arith.constant 1.000000e+00 : f32
    %140 = vector.broadcast %cst_38 : f32 to vector<2x96xf32>
    %141 = arith.addf %140, %139 : vector<2x96xf32>
    %142 = arith.divf %140, %141 : vector<2x96xf32>
    %143 = vector.extract_strided_slice %136 {offsets = [0, 96], sizes = [2, 32], strides = [1, 1]} : vector<2x128xf32> to vector<2x32xf32>
    %144 = math.tanh %143 : vector<2x32xf32>
    %145 = vector.extract_strided_slice %142 {offsets = [0, 0], sizes = [2, 32], strides = [1, 1]} : vector<2x96xf32> to vector<2x32xf32>
    %146 = vector.extract_strided_slice %142 {offsets = [0, 32], sizes = [2, 32], strides = [1, 1]} : vector<2x96xf32> to vector<2x32xf32>
    %147 = vector.extract_strided_slice %142 {offsets = [0, 64], sizes = [2, 32], strides = [1, 1]} : vector<2x96xf32> to vector<2x32xf32>
    %148 = arith.mulf %146, %112 : vector<2x32xf32>
    %149 = arith.mulf %145, %144 : vector<2x32xf32>
    %150 = arith.addf %148, %149 : vector<2x32xf32>
    %151 = math.tanh %150 : vector<2x32xf32>
    %152 = arith.mulf %147, %151 : vector<2x32xf32>
    %153 = tpu.concatenate %152, %133 in 1 : vector<2x32xf32>, vector<2x32xf32> -> vector<2x64xf32>
    %cst_39 = arith.constant dense<0.000000e+00> : vector<2x128xf32>
    %154 = tpu.matmul %153, %3, %cst_39 {dimension_numbers = #tpu.dot_dimension_numbers<[1], [0], [0], [1], [0, 0, 1, 1], [], []>} : vector<2x64xf32>, vector<64x128xf32>, vector<2x128xf32> -> vector<2x128xf32>
    %155 = arith.addf %154, %6 : vector<2x128xf32>
    %156 = vector.extract_strided_slice %155 {offsets = [0, 0], sizes = [2, 96], strides = [1, 1]} : vector<2x128xf32> to vector<2x96xf32>
    %157 = arith.negf %156 : vector<2x96xf32>
    %158 = math.exp %157 : vector<2x96xf32>
    %cst_40 = arith.constant 1.000000e+00 : f32
    %159 = vector.broadcast %cst_40 : f32 to vector<2x96xf32>
    %160 = arith.addf %159, %158 : vector<2x96xf32>
    %161 = arith.divf %159, %160 : vector<2x96xf32>
    %162 = vector.extract_strided_slice %155 {offsets = [0, 96], sizes = [2, 32], strides = [1, 1]} : vector<2x128xf32> to vector<2x32xf32>
    %163 = math.tanh %162 : vector<2x32xf32>
    %164 = vector.extract_strided_slice %161 {offsets = [0, 0], sizes = [2, 32], strides = [1, 1]} : vector<2x96xf32> to vector<2x32xf32>
    %165 = vector.extract_strided_slice %161 {offsets = [0, 32], sizes = [2, 32], strides = [1, 1]} : vector<2x96xf32> to vector<2x32xf32>
    %166 = vector.extract_strided_slice %161 {offsets = [0, 64], sizes = [2, 32], strides = [1, 1]} : vector<2x96xf32> to vector<2x32xf32>
    %167 = arith.mulf %165, %131 : vector<2x32xf32>
    %168 = arith.mulf %164, %163 : vector<2x32xf32>
    %169 = arith.addf %167, %168 : vector<2x32xf32>
    %170 = math.tanh %169 : vector<2x32xf32>
    %171 = arith.mulf %166, %170 : vector<2x32xf32>
    %172 = vector.extract_strided_slice %15 {offsets = [8, 0], sizes = [2, 128], strides = [1, 1]} : vector<16x128xf32> to vector<2x128xf32>
    %cst_41 = arith.constant dense<0.000000e+00> : vector<2x128xf32>
    %173 = tpu.matmul %152, %1, %cst_41 {dimension_numbers = #tpu.dot_dimension_numbers<[1], [0], [0], [1], [0, 0, 1, 1], [], []>} : vector<2x32xf32>, vector<32x128xf32>, vector<2x128xf32> -> vector<2x128xf32>
    %174 = arith.addf %172, %173 : vector<2x128xf32>
    %175 = vector.extract_strided_slice %174 {offsets = [0, 0], sizes = [2, 96], strides = [1, 1]} : vector<2x128xf32> to vector<2x96xf32>
    %176 = arith.negf %175 : vector<2x96xf32>
    %177 = math.exp %176 : vector<2x96xf32>
    %cst_42 = arith.constant 1.000000e+00 : f32
    %178 = vector.broadcast %cst_42 : f32 to vector<2x96xf32>
    %179 = arith.addf %178, %177 : vector<2x96xf32>
    %180 = arith.divf %178, %179 : vector<2x96xf32>
    %181 = vector.extract_strided_slice %174 {offsets = [0, 96], sizes = [2, 32], strides = [1, 1]} : vector<2x128xf32> to vector<2x32xf32>
    %182 = math.tanh %181 : vector<2x32xf32>
    %183 = vector.extract_strided_slice %180 {offsets = [0, 0], sizes = [2, 32], strides = [1, 1]} : vector<2x96xf32> to vector<2x32xf32>
    %184 = vector.extract_strided_slice %180 {offsets = [0, 32], sizes = [2, 32], strides = [1, 1]} : vector<2x96xf32> to vector<2x32xf32>
    %185 = vector.extract_strided_slice %180 {offsets = [0, 64], sizes = [2, 32], strides = [1, 1]} : vector<2x96xf32> to vector<2x32xf32>
    %186 = arith.mulf %184, %150 : vector<2x32xf32>
    %187 = arith.mulf %183, %182 : vector<2x32xf32>
    %188 = arith.addf %186, %187 : vector<2x32xf32>
    %189 = math.tanh %188 : vector<2x32xf32>
    %190 = arith.mulf %185, %189 : vector<2x32xf32>
    %191 = tpu.concatenate %190, %171 in 1 : vector<2x32xf32>, vector<2x32xf32> -> vector<2x64xf32>
    %cst_43 = arith.constant dense<0.000000e+00> : vector<2x128xf32>
    %192 = tpu.matmul %191, %3, %cst_43 {dimension_numbers = #tpu.dot_dimension_numbers<[1], [0], [0], [1], [0, 0, 1, 1], [], []>} : vector<2x64xf32>, vector<64x128xf32>, vector<2x128xf32> -> vector<2x128xf32>
    %193 = arith.addf %192, %6 : vector<2x128xf32>
    %194 = vector.extract_strided_slice %193 {offsets = [0, 0], sizes = [2, 96], strides = [1, 1]} : vector<2x128xf32> to vector<2x96xf32>
    %195 = arith.negf %194 : vector<2x96xf32>
    %196 = math.exp %195 : vector<2x96xf32>
    %cst_44 = arith.constant 1.000000e+00 : f32
    %197 = vector.broadcast %cst_44 : f32 to vector<2x96xf32>
    %198 = arith.addf %197, %196 : vector<2x96xf32>
    %199 = arith.divf %197, %198 : vector<2x96xf32>
    %200 = vector.extract_strided_slice %193 {offsets = [0, 96], sizes = [2, 32], strides = [1, 1]} : vector<2x128xf32> to vector<2x32xf32>
    %201 = math.tanh %200 : vector<2x32xf32>
    %202 = vector.extract_strided_slice %199 {offsets = [0, 0], sizes = [2, 32], strides = [1, 1]} : vector<2x96xf32> to vector<2x32xf32>
    %203 = vector.extract_strided_slice %199 {offsets = [0, 32], sizes = [2, 32], strides = [1, 1]} : vector<2x96xf32> to vector<2x32xf32>
    %204 = vector.extract_strided_slice %199 {offsets = [0, 64], sizes = [2, 32], strides = [1, 1]} : vector<2x96xf32> to vector<2x32xf32>
    %205 = arith.mulf %203, %169 : vector<2x32xf32>
    %206 = arith.mulf %202, %201 : vector<2x32xf32>
    %207 = arith.addf %205, %206 : vector<2x32xf32>
    %208 = math.tanh %207 : vector<2x32xf32>
    %209 = arith.mulf %204, %208 : vector<2x32xf32>
    %210 = vector.extract_strided_slice %15 {offsets = [10, 0], sizes = [2, 128], strides = [1, 1]} : vector<16x128xf32> to vector<2x128xf32>
    %cst_45 = arith.constant dense<0.000000e+00> : vector<2x128xf32>
    %211 = tpu.matmul %190, %1, %cst_45 {dimension_numbers = #tpu.dot_dimension_numbers<[1], [0], [0], [1], [0, 0, 1, 1], [], []>} : vector<2x32xf32>, vector<32x128xf32>, vector<2x128xf32> -> vector<2x128xf32>
    %212 = arith.addf %210, %211 : vector<2x128xf32>
    %213 = vector.extract_strided_slice %212 {offsets = [0, 0], sizes = [2, 96], strides = [1, 1]} : vector<2x128xf32> to vector<2x96xf32>
    %214 = arith.negf %213 : vector<2x96xf32>
    %215 = math.exp %214 : vector<2x96xf32>
    %cst_46 = arith.constant 1.000000e+00 : f32
    %216 = vector.broadcast %cst_46 : f32 to vector<2x96xf32>
    %217 = arith.addf %216, %215 : vector<2x96xf32>
    %218 = arith.divf %216, %217 : vector<2x96xf32>
    %219 = vector.extract_strided_slice %212 {offsets = [0, 96], sizes = [2, 32], strides = [1, 1]} : vector<2x128xf32> to vector<2x32xf32>
    %220 = math.tanh %219 : vector<2x32xf32>
    %221 = vector.extract_strided_slice %218 {offsets = [0, 0], sizes = [2, 32], strides = [1, 1]} : vector<2x96xf32> to vector<2x32xf32>
    %222 = vector.extract_strided_slice %218 {offsets = [0, 32], sizes = [2, 32], strides = [1, 1]} : vector<2x96xf32> to vector<2x32xf32>
    %223 = vector.extract_strided_slice %218 {offsets = [0, 64], sizes = [2, 32], strides = [1, 1]} : vector<2x96xf32> to vector<2x32xf32>
    %224 = arith.mulf %222, %188 : vector<2x32xf32>
    %225 = arith.mulf %221, %220 : vector<2x32xf32>
    %226 = arith.addf %224, %225 : vector<2x32xf32>
    %227 = math.tanh %226 : vector<2x32xf32>
    %228 = arith.mulf %223, %227 : vector<2x32xf32>
    %229 = tpu.concatenate %228, %209 in 1 : vector<2x32xf32>, vector<2x32xf32> -> vector<2x64xf32>
    %cst_47 = arith.constant dense<0.000000e+00> : vector<2x128xf32>
    %230 = tpu.matmul %229, %3, %cst_47 {dimension_numbers = #tpu.dot_dimension_numbers<[1], [0], [0], [1], [0, 0, 1, 1], [], []>} : vector<2x64xf32>, vector<64x128xf32>, vector<2x128xf32> -> vector<2x128xf32>
    %231 = arith.addf %230, %6 : vector<2x128xf32>
    %232 = vector.extract_strided_slice %231 {offsets = [0, 0], sizes = [2, 96], strides = [1, 1]} : vector<2x128xf32> to vector<2x96xf32>
    %233 = arith.negf %232 : vector<2x96xf32>
    %234 = math.exp %233 : vector<2x96xf32>
    %cst_48 = arith.constant 1.000000e+00 : f32
    %235 = vector.broadcast %cst_48 : f32 to vector<2x96xf32>
    %236 = arith.addf %235, %234 : vector<2x96xf32>
    %237 = arith.divf %235, %236 : vector<2x96xf32>
    %238 = vector.extract_strided_slice %231 {offsets = [0, 96], sizes = [2, 32], strides = [1, 1]} : vector<2x128xf32> to vector<2x32xf32>
    %239 = math.tanh %238 : vector<2x32xf32>
    %240 = vector.extract_strided_slice %237 {offsets = [0, 0], sizes = [2, 32], strides = [1, 1]} : vector<2x96xf32> to vector<2x32xf32>
    %241 = vector.extract_strided_slice %237 {offsets = [0, 32], sizes = [2, 32], strides = [1, 1]} : vector<2x96xf32> to vector<2x32xf32>
    %242 = vector.extract_strided_slice %237 {offsets = [0, 64], sizes = [2, 32], strides = [1, 1]} : vector<2x96xf32> to vector<2x32xf32>
    %243 = arith.mulf %241, %207 : vector<2x32xf32>
    %244 = arith.mulf %240, %239 : vector<2x32xf32>
    %245 = arith.addf %243, %244 : vector<2x32xf32>
    %246 = math.tanh %245 : vector<2x32xf32>
    %247 = arith.mulf %242, %246 : vector<2x32xf32>
    %248 = vector.extract_strided_slice %15 {offsets = [12, 0], sizes = [2, 128], strides = [1, 1]} : vector<16x128xf32> to vector<2x128xf32>
    %cst_49 = arith.constant dense<0.000000e+00> : vector<2x128xf32>
    %249 = tpu.matmul %228, %1, %cst_49 {dimension_numbers = #tpu.dot_dimension_numbers<[1], [0], [0], [1], [0, 0, 1, 1], [], []>} : vector<2x32xf32>, vector<32x128xf32>, vector<2x128xf32> -> vector<2x128xf32>
    %250 = arith.addf %248, %249 : vector<2x128xf32>
    %251 = vector.extract_strided_slice %250 {offsets = [0, 0], sizes = [2, 96], strides = [1, 1]} : vector<2x128xf32> to vector<2x96xf32>
    %252 = arith.negf %251 : vector<2x96xf32>
    %253 = math.exp %252 : vector<2x96xf32>
    %cst_50 = arith.constant 1.000000e+00 : f32
    %254 = vector.broadcast %cst_50 : f32 to vector<2x96xf32>
    %255 = arith.addf %254, %253 : vector<2x96xf32>
    %256 = arith.divf %254, %255 : vector<2x96xf32>
    %257 = vector.extract_strided_slice %250 {offsets = [0, 96], sizes = [2, 32], strides = [1, 1]} : vector<2x128xf32> to vector<2x32xf32>
    %258 = math.tanh %257 : vector<2x32xf32>
    %259 = vector.extract_strided_slice %256 {offsets = [0, 0], sizes = [2, 32], strides = [1, 1]} : vector<2x96xf32> to vector<2x32xf32>
    %260 = vector.extract_strided_slice %256 {offsets = [0, 32], sizes = [2, 32], strides = [1, 1]} : vector<2x96xf32> to vector<2x32xf32>
    %261 = vector.extract_strided_slice %256 {offsets = [0, 64], sizes = [2, 32], strides = [1, 1]} : vector<2x96xf32> to vector<2x32xf32>
    %262 = arith.mulf %260, %226 : vector<2x32xf32>
    %263 = arith.mulf %259, %258 : vector<2x32xf32>
    %264 = arith.addf %262, %263 : vector<2x32xf32>
    %265 = math.tanh %264 : vector<2x32xf32>
    %266 = arith.mulf %261, %265 : vector<2x32xf32>
    %267 = tpu.concatenate %266, %247 in 1 : vector<2x32xf32>, vector<2x32xf32> -> vector<2x64xf32>
    %cst_51 = arith.constant dense<0.000000e+00> : vector<2x128xf32>
    %268 = tpu.matmul %267, %3, %cst_51 {dimension_numbers = #tpu.dot_dimension_numbers<[1], [0], [0], [1], [0, 0, 1, 1], [], []>} : vector<2x64xf32>, vector<64x128xf32>, vector<2x128xf32> -> vector<2x128xf32>
    %269 = arith.addf %268, %6 : vector<2x128xf32>
    %270 = vector.extract_strided_slice %269 {offsets = [0, 0], sizes = [2, 96], strides = [1, 1]} : vector<2x128xf32> to vector<2x96xf32>
    %271 = arith.negf %270 : vector<2x96xf32>
    %272 = math.exp %271 : vector<2x96xf32>
    %cst_52 = arith.constant 1.000000e+00 : f32
    %273 = vector.broadcast %cst_52 : f32 to vector<2x96xf32>
    %274 = arith.addf %273, %272 : vector<2x96xf32>
    %275 = arith.divf %273, %274 : vector<2x96xf32>
    %276 = vector.extract_strided_slice %269 {offsets = [0, 96], sizes = [2, 32], strides = [1, 1]} : vector<2x128xf32> to vector<2x32xf32>
    %277 = math.tanh %276 : vector<2x32xf32>
    %278 = vector.extract_strided_slice %275 {offsets = [0, 0], sizes = [2, 32], strides = [1, 1]} : vector<2x96xf32> to vector<2x32xf32>
    %279 = vector.extract_strided_slice %275 {offsets = [0, 32], sizes = [2, 32], strides = [1, 1]} : vector<2x96xf32> to vector<2x32xf32>
    %280 = vector.extract_strided_slice %275 {offsets = [0, 64], sizes = [2, 32], strides = [1, 1]} : vector<2x96xf32> to vector<2x32xf32>
    %281 = arith.mulf %279, %245 : vector<2x32xf32>
    %282 = arith.mulf %278, %277 : vector<2x32xf32>
    %283 = arith.addf %281, %282 : vector<2x32xf32>
    %284 = math.tanh %283 : vector<2x32xf32>
    %285 = arith.mulf %280, %284 : vector<2x32xf32>
    %286 = vector.extract_strided_slice %15 {offsets = [14, 0], sizes = [2, 128], strides = [1, 1]} : vector<16x128xf32> to vector<2x128xf32>
    %cst_53 = arith.constant dense<0.000000e+00> : vector<2x128xf32>
    %287 = tpu.matmul %266, %1, %cst_53 {dimension_numbers = #tpu.dot_dimension_numbers<[1], [0], [0], [1], [0, 0, 1, 1], [], []>} : vector<2x32xf32>, vector<32x128xf32>, vector<2x128xf32> -> vector<2x128xf32>
    %288 = arith.addf %286, %287 : vector<2x128xf32>
    %289 = vector.extract_strided_slice %288 {offsets = [0, 0], sizes = [2, 96], strides = [1, 1]} : vector<2x128xf32> to vector<2x96xf32>
    %290 = arith.negf %289 : vector<2x96xf32>
    %291 = math.exp %290 : vector<2x96xf32>
    %cst_54 = arith.constant 1.000000e+00 : f32
    %292 = vector.broadcast %cst_54 : f32 to vector<2x96xf32>
    %293 = arith.addf %292, %291 : vector<2x96xf32>
    %294 = arith.divf %292, %293 : vector<2x96xf32>
    %295 = vector.extract_strided_slice %288 {offsets = [0, 96], sizes = [2, 32], strides = [1, 1]} : vector<2x128xf32> to vector<2x32xf32>
    %296 = math.tanh %295 : vector<2x32xf32>
    %297 = vector.extract_strided_slice %294 {offsets = [0, 0], sizes = [2, 32], strides = [1, 1]} : vector<2x96xf32> to vector<2x32xf32>
    %298 = vector.extract_strided_slice %294 {offsets = [0, 32], sizes = [2, 32], strides = [1, 1]} : vector<2x96xf32> to vector<2x32xf32>
    %299 = vector.extract_strided_slice %294 {offsets = [0, 64], sizes = [2, 32], strides = [1, 1]} : vector<2x96xf32> to vector<2x32xf32>
    %300 = arith.mulf %298, %264 : vector<2x32xf32>
    %301 = arith.mulf %297, %296 : vector<2x32xf32>
    %302 = arith.addf %300, %301 : vector<2x32xf32>
    %303 = math.tanh %302 : vector<2x32xf32>
    %304 = arith.mulf %299, %303 : vector<2x32xf32>
    %305 = tpu.concatenate %304, %285 in 1 : vector<2x32xf32>, vector<2x32xf32> -> vector<2x64xf32>
    %cst_55 = arith.constant dense<0.000000e+00> : vector<2x128xf32>
    %306 = tpu.matmul %305, %3, %cst_55 {dimension_numbers = #tpu.dot_dimension_numbers<[1], [0], [0], [1], [0, 0, 1, 1], [], []>} : vector<2x64xf32>, vector<64x128xf32>, vector<2x128xf32> -> vector<2x128xf32>
    %307 = arith.addf %306, %6 : vector<2x128xf32>
    %308 = vector.extract_strided_slice %307 {offsets = [0, 0], sizes = [2, 96], strides = [1, 1]} : vector<2x128xf32> to vector<2x96xf32>
    %309 = arith.negf %308 : vector<2x96xf32>
    %310 = math.exp %309 : vector<2x96xf32>
    %cst_56 = arith.constant 1.000000e+00 : f32
    %311 = vector.broadcast %cst_56 : f32 to vector<2x96xf32>
    %312 = arith.addf %311, %310 : vector<2x96xf32>
    %313 = arith.divf %311, %312 : vector<2x96xf32>
    %314 = vector.extract_strided_slice %307 {offsets = [0, 96], sizes = [2, 32], strides = [1, 1]} : vector<2x128xf32> to vector<2x32xf32>
    %315 = math.tanh %314 : vector<2x32xf32>
    %316 = vector.extract_strided_slice %313 {offsets = [0, 0], sizes = [2, 32], strides = [1, 1]} : vector<2x96xf32> to vector<2x32xf32>
    %317 = vector.extract_strided_slice %313 {offsets = [0, 32], sizes = [2, 32], strides = [1, 1]} : vector<2x96xf32> to vector<2x32xf32>
    %318 = vector.extract_strided_slice %313 {offsets = [0, 64], sizes = [2, 32], strides = [1, 1]} : vector<2x96xf32> to vector<2x32xf32>
    %319 = arith.mulf %317, %283 : vector<2x32xf32>
    %320 = arith.mulf %316, %315 : vector<2x32xf32>
    %321 = arith.addf %319, %320 : vector<2x32xf32>
    %322 = math.tanh %321 : vector<2x32xf32>
    %323 = arith.mulf %318, %322 : vector<2x32xf32>
    %324 = tpu.concatenate %57, %95, %133, %171, %209, %247, %285, %323 in 0 : vector<2x32xf32>, vector<2x32xf32>, vector<2x32xf32>, vector<2x32xf32>, vector<2x32xf32>, vector<2x32xf32>, vector<2x32xf32>, vector<2x32xf32> -> vector<16x32xf32>
    %cst_57 = arith.constant dense<0.000000e+00> : vector<16x32xf32>
    %325 = tpu.matmul %324, %7, %cst_57 {dimension_numbers = #tpu.dot_dimension_numbers<[1], [0], [0], [1], [0, 0, 1, 1], [], []>} : vector<16x32xf32>, vector<32x32xf32>, vector<16x32xf32> -> vector<16x32xf32>
    %c0_58 = arith.constant 0 : index
    %c0_59 = arith.constant 0 : index
    %326 = vector.load %arg1[%c0_58, %c0_59] : memref<16x32xf32, #tpu.memory_space<vmem>>, vector<16x32xf32>
    %cst_60 = arith.constant dense<0.000000e+00> : vector<16x32xf32>
    %327 = tpu.matmul %326, %8, %cst_60 {dimension_numbers = #tpu.dot_dimension_numbers<[1], [0], [0], [1], [0, 0, 1, 1], [], []>} : vector<16x32xf32>, vector<32x32xf32>, vector<16x32xf32> -> vector<16x32xf32>
    %328 = arith.addf %325, %327 : vector<16x32xf32>
    %329 = vector.broadcast %9 : vector<1x32xf32> to vector<16x32xf32>
    %330 = arith.addf %328, %329 : vector<16x32xf32>
    %cst_61 = arith.constant 0.000000e+00 : f32
    %331 = vector.broadcast %cst_61 : f32 to vector<16x32xf32>
    %332 = arith.maximumf %330, %331 : vector<16x32xf32>
    %333 = vector.broadcast %10 : vector<1x32xf32> to vector<16x32xf32>
    %334 = arith.mulf %332, %333 : vector<16x32xf32>
    %cst_62 = arith.constant dense<0.000000e+00> : vector<16xf32>
    %335 = vector.multi_reduction <add>, %334, %cst_62 [1] : vector<16x32xf32> to vector<16xf32>
    %336 = vector.shape_cast %335 : vector<16xf32> to vector<16x1xf32>
    %337 = vector.broadcast %11 : vector<1x1xf32> to vector<16x1xf32>
    %338 = arith.addf %336, %337 : vector<16x1xf32>
    %c0_63 = arith.constant 0 : index
    %c0_64 = arith.constant 0 : index
    %339 = vector.load %arg12[%c0_63, %c0_64] : memref<16x1xf32, #tpu.memory_space<vmem>>, vector<16x1xf32>
    tpu.vector_store %arg12[%c0_63, %c0_64], %338 {strides = array<i32>} : memref<16x1xf32, #tpu.memory_space<vmem>>, vector<16x1xf32>,
    return
  }
}

</mosaic_0001>

<bundles_post_ra>
// kernel: dkt_forward.1
= control target key start
LH: loop header
LB: loop body
LE: loop exit
PB: predicated region body
PF: predicated region fallthrough
CT: control target
= control target key end

     0   :  { %v2692_v2 = vmov 0.0   ;;  %vm2693_vm0 = vmmov 0   ;;  %vm90_vm1 = vcmask 523264   ;;  %s2694_s13 = smov 32   ;;  %s2695_s29 = smov 64   ;;  %vm172_vm2 = vcmask 261120   ;;  %s3360_s2 = inlined_call_operand.vmem [shape: f32[64,128], index: 2, kind: input, shape index: {}]   ;;  %s3361_s3 = inlined_call_operand.vmem [shape: f32[32,128], index: 3, kind: input, shape index: {}]   ;;  %s3362_s0 = inlined_call_operand.vmem [shape: f32[16,64], index: 0, kind: input, shape index: {}]   ;;  %s3363_s4 = inlined_call_operand.vmem [shape: f32[1,128], index: 4, kind: input, shape index: {}]   ;;  %s3364_s5 = inlined_call_operand.vmem [shape: f32[64,128], index: 5, kind: input, shape index: {}]   ;;  %s3365_s6 = inlined_call_operand.vmem [shape: f32[1,128], index: 6, kind: input, shape index: {}]   ;;  %s3366_s8 = inlined_call_operand.vmem [shape: f32[32,32], index: 8, kind: input, shape index: {}]   ;;  %s3367_s1 = inlined_call_operand.vmem [shape: f32[16,32], index: 1, kind: input, shape index: {}]   ;;  %s3368_s7 = inlined_call_operand.vmem [shape: f32[32,32], index: 7, kind: input, shape index: {}]   ;;  %s3369_s11 = inlined_call_operand.<no memory space> [shape: f32[1,1], index: 11, kind: input, shape index: {}]   ;;  %s3370_s9 = inlined_call_operand.vmem [shape: f32[1,32], index: 9, kind: input, shape index: {}]   ;;  %s3371_s10 = inlined_call_operand.vmem [shape: f32[1,32], index: 10, kind: input, shape index: {}]   ;;  %s3372_s12 = inlined_call_operand.vmem [shape: f32[16,1], index: 12, kind: output, shape index: {}]  }
   0x1   :  { %v50_v0 = vld [vmem:[%s3360_s2 + $0x38] sm:$0xff]  ;;  %v49_v1 = vld [vmem:[%s3360_s2 + $0x30] sm:$0xff]  ;;  %2284 = vmatprep.subr.mxu1 %v2692_v2  ;;  %2292 = vmatprep.mubr.msk.f32.mxu1 %vm2693_vm0, %v2692_v2  ;;  %v48_v3 = vld [vmem:[%s3360_s2 + $0x28] sm:$0xff]  ;;  %vm1873_vm3 = vcmask 1041408   ;;  %vm1875_vm4 = vcmask 1043456   ;;  %vm1877_vm5 = vcmask 1045504  }
   0x2   :  { %2265 = vmatprep.subr.mxu0 %v50_v0  ;;  %v2777_v4 = vld [vmem:[%s3361_s3 + $0x18] sm:$0xff]  ;;  %v2782_v5 = vld [vmem:[%s3361_s3 + $0x10] sm:$0xff]  ;;  %v47_v6 = vld [vmem:[%s3360_s2 + $0x20] sm:$0xff]  ;;  %vm2082_vm6 = vcmask 7168  }
   0x3   :  { %2266 = vmatpush3.msra.mxu0 %v50_v0  ;;  %2285 = vmatpush3.msra.mxu1 %v2777_v4  ;;  %v82_v7 = vld [vmem:[%s3362_s0] sm:$0xff]  ;;  %v2796_v8 = vld [vmem:[%s3361_s3 + $0x8] sm:$0xff]  ;;  %v46_v9 = vld [vmem:[%s3360_s2 + $0x18] sm:$0xff] }
   0x4   :  { %2267 = vmatprep.subr.mxu0 %v49_v1  ;;  %2286 = vmatprep.subr.mxu1 %v2692_v2  ;;  %v2806_v10 = vld [vmem:[%s3361_s3] sm:$0xff]  ;;  %v45_v11 = vld [vmem:[%s3360_s2 + $0x10] sm:$0xff]  ;;  %v44_v12 = vld [vmem:[%s3360_s2 + $0x8] sm:$0xff] }
   0x5   :  { %2268 = vmatpush3.msra.mxu0 %v49_v1  ;;  %2287 = vmatpush3.msra.mxu1 %v2782_v5  ;;  %v43_v13 = vld [vmem:[%s3360_s2] sm:$0xff]  ;;  %v83_v14 = vld [vmem:[%s3362_s0 + $0x8] sm:$0xff]  ;;  %v2855_v33 = vld [vmem:[%s3364_s5 + $0x38] sm:$0xff]  ;;  %s2696_s2 = smov 96  }
   0x6   :  { %2269 = vmatprep.subr.mxu0 %v48_v3  ;;  %2288 = vmatprep.subr.mxu1 %v2692_v2  ;;  %v2090_v17 = vld [vmem:[%s3363_s4] ss:$0 sm:$0xff]  ;;  %v2860_v34 = vld [vmem:[%s3364_s5 + $0x30] sm:$0xff]  ;;  %v2867_v35 = vld [vmem:[%s3364_s5 + $0x28] sm:$0xff] }
   0x7   :  { %2270 = vmatpush3.msra.mxu0 %v48_v3  ;;  %2281 = vmatprep.mubr.msk.f32.mxu0 %vm90_vm1, %v82_v7  ;;  %v2874_v36 = vld [vmem:[%s3364_s5 + $0x20] sm:$0xff]  ;;  %v2881_v37 = vld [vmem:[%s3364_s5 + $0x18] sm:$0xff]  ;;  %v2888_v38 = vld [vmem:[%s3364_s5 + $0x10] sm:$0xff] }
   0x8   :  { %2271 = vmatprep.subr.mxu0 %v47_v6  ;;  %2289 = vmatpush3.msra.mxu1 %v2796_v8  ;;  %v2896_v40 = vld [vmem:[%s3364_s5 + $0x8] sm:$0xff]  ;;  %v2905_v41 = vld [vmem:[%s3364_s5] sm:$0xff] }
   0x9   :  { %2272 = vmatpush3.msra.mxu0 %v47_v6  ;;  %2290 = vmatprep.subr.mxu1 %v2692_v2  ;;  %v2944_v46 = vld [vmem:[%s3365_s6] ss:$0 sm:$0xff] }
   0xa   :  { %2273 = vmatprep.subr.mxu0 %v46_v9  ;;  %2291 = vmatpush3.msra.mxu1 %v2806_v10 }
   0xb   :  { %2274 = vmatpush3.msra.mxu0 %v46_v9  ;;  %2293 = vmatmul.mubr.f32.vlgmr.msra.gmra.mxu1 %v2692_v2 }
   0xc   :  { %2275 = vmatprep.subr.mxu0 %v45_v11  ;;  %2295 = vmatprep.subr.mxu1 %v2692_v2 }
   0xd   :  { %2276 = vmatpush3.msra.mxu0 %v45_v11  ;;  %2311 = vmatprep.mubr.msk.f32.mxu1 %vm2693_vm0, %v2692_v2 }
   0xe   :  { %2277 = vmatprep.subr.mxu0 %v44_v12  ;;  %2296 = vmatpush3.msra.mxu1 %v2855_v33 }
   0xf   :  { %2278 = vmatpush3.msra.mxu0 %v44_v12  ;;  %2297 = vmatprep.subr.mxu1 %v2692_v2 }
  0x10   :  { %2279 = vmatprep.subr.mxu0 %v43_v13  ;;  %2298 = vmatpush3.msra.mxu1 %v2860_v34 }
  0x11   :  { %2280 = vmatpush3.msra.mxu0 %v43_v13  ;;  %2299 = vmatprep.subr.mxu1 %v2692_v2 }
  0x12   :  { %2282 = vmatmul.mubr.msk.f32.vlgmr.msra.gmra.mxu0 %vm90_vm1, %v83_v14  ;;  %2314 = vmatprep.subr.mxu0 %v2692_v2 }
  0x13   :  { %2315 = vmatpush3.msra.mxu0 %v2777_v4  ;;  %2322 = vmatprep.mubr.msk.f32.mxu0 %vm2693_vm0, %v2692_v2 }
  0x14   :  { %2316 = vmatprep.subr.mxu0 %v2692_v2  ;;  %2300 = vmatpush3.msra.mxu1 %v2867_v35 }
  0x15   :  { %2317 = vmatpush3.msra.mxu0 %v2782_v5  ;;  %2301 = vmatprep.subr.mxu1 %v2692_v2 }
  0x16   :  { %2318 = vmatprep.subr.mxu0 %v2692_v2  ;;  %2302 = vmatpush3.msra.mxu1 %v2874_v36 }
  0x17   :  { %2319 = vmatpush3.msra.mxu0 %v2796_v8  ;;  %2303 = vmatprep.subr.mxu1 %v2692_v2 }
  0x18   :  { %2320 = vmatprep.subr.mxu0 %v2692_v2  ;;  %2304 = vmatpush3.msra.mxu1 %v2881_v37 }
  0x19   :  { %2321 = vmatpush3.msra.mxu0 %v2806_v10  ;;  %2305 = vmatprep.subr.mxu1 %v2692_v2 }
  0x1a   :  { %2325 = vmatprep.subr.mxu0 %v2692_v2  ;;  %2306 = vmatpush3.msra.mxu1 %v2888_v38 }
  0x1b   :  { %2307 = vmatprep.subr.mxu1 %v2692_v2 }
  0x1c   :  { %2308 = vmatpush3.msra.mxu1 %v2896_v40 }
  0x1d   :  { %2309 = vmatprep.subr.mxu1 %v2692_v2 }
  0x1e   :  { %2310 = vmatpush3.msra.mxu1 %v2905_v41 }
  0x1f   :  { %2344 = vmatprep.subr.mxu1 %v2692_v2 }
  0xcb   :  { %v242_v15 = vpop.f32.mrf.mxu1 }
  0xcd   :  { %v2294_v16 = vpop.f32.mrf.mxu1 }
  0xd2   :  { %v2283_v18 = vpop.f32.mrf.mxu0 }
  0xd3   :  { %v2842_v19 = vadd.f32 %v2283_v18, %v2090_v17 }
  0xd4   :  { %v163_v20 = vpop.f32.mrf.mxu0 }
  0xd5   :  { %v2844_v21 = vadd.f32 %v2090_v17, %v163_v20 }
  0xd7   :  { %v246_v22 = vadd.f32 %v242_v15, %v2844_v21 }
  0xd9   :  { %2551 = vtanh.f32 %v246_v22  ;;  %v2093_v24 = vmul.f32 -1.442695, %v246_v22 }
  0xdb   :  { %2553 = vpow2.f32 %v2093_v24 }
  0xe6   :  { %v2552_v23 = vpop.eup %2551 }
  0xe7   :  { %256 = vrot.lane.b32.xlu0 %v2552_v23, %s2694_s13 }
  0xe8   :  { %v2554_v25 = vpop.eup %2553 }
  0xe9   :  { %v250_v26 = vadd.f32 1.0, %v2554_v25 }
  0xeb   :  { %2555 = vrcp.f32 %v250_v26 }
  0xf8   :  { %v2556_v27 = vpop.eup %2555 }
  0xf9   :  { %v254_v30 = vmul.f32 0.0, %v2556_v27 }
 0x159   :  { %v257_v28 = vpop.permute.xlu0 %256 }
 0x15a   :  { %v259_v29 = vmul.f32 %v2556_v27, %v257_v28 }
 0x15c   :  { %261 = vrot.lane.b32.xlu0 %v259_v29, %s2694_s13 }
 0x1ce   :  { %v262_v31 = vpop.permute.xlu0 %261 }
 0x1cf   :  { %v2849_v32 = vadd.f32 %v262_v31, %v254_v30 }
 0x1d1   :  { %2557 = vtanh.f32 %v2849_v32  ;;  %v457_v7 = vrot.slane %v2849_v32, 6 }
 0x1de   :  { %v2558_v39 = vpop.eup %2557 }
 0x1df   :  { %267 = vrot.lane.b32.xlu1 %v2558_v39, %s2694_s13 }
 0x251   :  { %v268_v42 = vpop.permute.xlu1 %267 }
 0x252   :  { %v270_v43 = vmul.f32 %v2556_v27, %v268_v42 }
 0x254   :  { %272 = vrot.lane.b32.xlu1 %v270_v43, %s2695_s29 }
 0x2c6   :  { %v273_v44 = vpop.permute.xlu1 %272 }
 0x2c7   :  { %v275_v45 = vsel %vm172_vm2, %v273_v44, 0.0  ;;  %2323 = vmatmul.mubr.msk.f32.vlgmr.msra.gmra.mxu0 %vm172_vm2, %v273_v44 }
 0x2c8   :  { %2312 = vmatmul.mubr.msk.f32.vlgmr.msra.gmra.mxu1 %vm90_vm1, %v275_v45  ;;  %2326 = vmatpush3.msra.mxu0 %v2855_v33 }
 0x2c9   :  { %2327 = vmatprep.subr.mxu0 %v2692_v2  ;;  %2345 = vmatpush3.msra.mxu1 %v2777_v4 }
 0x2ca   :  { %2328 = vmatpush3.msra.mxu0 %v2860_v34  ;;  %2346 = vmatprep.subr.mxu1 %v2692_v2 }
 0x2cb   :  { %2329 = vmatprep.subr.mxu0 %v2692_v2  ;;  %2347 = vmatpush3.msra.mxu1 %v2782_v5 }
 0x2cc   :  { %2330 = vmatpush3.msra.mxu0 %v2867_v35  ;;  %2348 = vmatprep.subr.mxu1 %v2692_v2 }
 0x2cd   :  { %2331 = vmatprep.subr.mxu0 %v2692_v2  ;;  %2349 = vmatpush3.msra.mxu1 %v2796_v8 }
 0x2ce   :  { %2332 = vmatpush3.msra.mxu0 %v2874_v36  ;;  %2350 = vmatprep.subr.mxu1 %v2692_v2 }
 0x2cf   :  { %2333 = vmatprep.subr.mxu0 %v2692_v2  ;;  %2341 = vmatprep.mubr.msk.f32.mxu0 %vm2693_vm0, %v2692_v2 }
 0x2d0   :  { %2334 = vmatpush3.msra.mxu0 %v2881_v37  ;;  %2351 = vmatpush3.msra.mxu1 %v2806_v10 }
 0x2d1   :  { %2335 = vmatprep.subr.mxu0 %v2692_v2  ;;  %2352 = vmatprep.mubr.msk.f32.mxu1 %vm2693_vm0, %v2692_v2 }
 0x2d2   :  { %2336 = vmatpush3.msra.mxu0 %v2888_v38  ;;  %2355 = vmatprep.subr.mxu1 %v2692_v2 }
 0x2d3   :  { %2337 = vmatprep.subr.mxu0 %v2692_v2 }
 0x2d4   :  { %2338 = vmatpush3.msra.mxu0 %v2896_v40 }
 0x2d5   :  { %2339 = vmatprep.subr.mxu0 %v2692_v2 }
 0x2d6   :  { %2340 = vmatpush3.msra.mxu0 %v2905_v41 }
 0x2d7   :  { %2374 = vmatprep.subr.mxu0 %v2692_v2 }
 0x387   :  { %v441_v47 = vpop.f32.mrf.mxu0 }
 0x388   :  { %v446_v48 = vrot.slane %v441_v47, 6  ;;  %v345_v49 = vpop.f32.mrf.mxu1 }
 0x389   :  { %v346_v50 = vadd.f32 %v2944_v46, %v345_v49  ;;  %v2324_v51 = vpop.f32.mrf.mxu0 }
 0x38a   :  { %v448_v52 = vadd.f32 %v446_v48, %v2844_v21  ;;  %v2313_v53 = vpop.f32.mrf.mxu1 }
 0x38b   :  { %2559 = vtanh.f32 %v346_v50  ;;  %v2095_v56 = vmul.f32 -1.442695, %v346_v50 }
 0x38c   :  { %2561 = vtanh.f32 %v448_v52  ;;  %v2097_v57 = vmul.f32 -1.442695, %v448_v52 }
 0x38d   :  { %2563 = vpow2.f32 %v2095_v56 }
 0x38e   :  { %2565 = vpow2.f32 %v2097_v57 }
 0x398   :  { %v2560_v54 = vpop.eup %2559 }
 0x399   :  { %v2562_v55 = vpop.eup %2561  ;;  %358 = vrot.lane.b32.xlu0 %v2560_v54, %s2694_s13 }
 0x39a   :  { %461 = vrot.lane.b32.xlu1 %v2562_v55, %s2694_s13  ;;  %v2564_v58 = vpop.eup %2563 }
 0x39b   :  { %v2566_v59 = vpop.eup %2565  ;;  %v352_v60 = vadd.f32 1.0, %v2564_v58 }
 0x39c   :  { %v452_v61 = vadd.f32 1.0, %v2566_v59 }
 0x39d   :  { %2567 = vrcp.f32 %v352_v60 }
 0x39e   :  { %2569 = vrcp.f32 %v452_v61 }
 0x3aa   :  { %v2568_v62 = vpop.eup %2567 }
 0x3ab   :  { %v2570_v0 = vpop.eup %2569  ;;  %v356_v9 = vmul.f32 0.0, %v2568_v62 }
 0x3ac   :  { %v459_v12 = vmul.f32 %v2570_v0, %v457_v7 }
 0x40b   :  { %v359_v63 = vpop.permute.xlu0 %358 }
 0x40c   :  { %v361_v1 = vmul.f32 %v2568_v62, %v359_v63  ;;  %v462_v3 = vpop.permute.xlu1 %461 }
 0x40d   :  { %v464_v6 = vmul.f32 %v2570_v0, %v462_v3 }
 0x40e   :  { %363 = vrot.lane.b32.xlu0 %v361_v1, %s2694_s13 }
 0x40f   :  { %466 = vrot.lane.b32.xlu1 %v464_v6, %s2694_s13 }
 0x480   :  { %v364_v11 = vpop.permute.xlu0 %363 }
 0x481   :  { %v2953_v13 = vadd.f32 %v364_v11, %v356_v9  ;;  %v467_v14 = vpop.permute.xlu1 %466 }
 0x482   :  { %v2955_v15 = vadd.f32 %v467_v14, %v459_v12 }
 0x483   :  { %2571 = vtanh.f32 %v2953_v13 }
 0x484   :  { %2573 = vtanh.f32 %v2955_v15 }
 0x490   :  { %v2572_v16 = vpop.eup %2571 }
 0x491   :  { %v2574_v17 = vpop.eup %2573  ;;  %369 = vrot.lane.b32.xlu0 %v2572_v16, %s2694_s13 }
 0x492   :  { %472 = vrot.lane.b32.xlu1 %v2574_v17, %s2694_s13 }
 0x503   :  { %v370_v18 = vpop.permute.xlu0 %369 }
 0x504   :  { %v2961_v20 = vmul.f32 %v2568_v62, %v370_v18  ;;  %v473_v22 = vpop.permute.xlu1 %472  ;;  %v671_v62 = vrot.slane %v2955_v15, 6 }
 0x505   :  { %v475_v23 = vmul.f32 %v2570_v0, %v473_v22 }
 0x506   :  { %v481_v24 = vrot.slane %v2961_v20, 6 }
 0x507   :  { %477 = vrot.lane.b32.xlu0 %v475_v23, %s2695_s29  ;;  %v584_v25 = vrot.slane %v475_v23, 2 }
 0x508   :  { %482 = vrot.lane.b32.xlu1 %v481_v24, %s2696_s2 }
 0x50b   :  { %585 = vrot.lane.b32.xlu0 %v584_v25, %s2695_s29 }
 0x579   :  { %v478_v26 = vpop.permute.xlu0 %477 }
 0x57a   :  { %v483_v27 = vpop.permute.xlu1 %482 }
 0x57b   :  { %v485_v28 = vsel %vm172_vm2, %v478_v26, %v483_v27 }
 0x57c   :  { %v487_v29 = vrot.slane %v485_v28, 2 }
 0x57d   :  { %v586_v30 = vpop.permute.xlu0 %585 }
 0x57e   :  { %2342 = vmatmul.mubr.msk.f32.vlgmr.msra.gmra.mxu0 %vm90_vm1, %v487_v29  ;;  %2353 = vmatmul.mubr.msk.f32.vlgmr.msra.gmra.mxu1 %vm172_vm2, %v586_v30 }
 0x57f   :  { %2356 = vmatpush3.msra.mxu1 %v2855_v33  ;;  %2375 = vmatpush3.msra.mxu0 %v2777_v4 }
 0x580   :  { %2357 = vmatprep.subr.mxu1 %v2692_v2  ;;  %2376 = vmatprep.subr.mxu0 %v2692_v2 }
 0x581   :  { %2358 = vmatpush3.msra.mxu1 %v2860_v34  ;;  %2377 = vmatpush3.msra.mxu0 %v2782_v5 }
 0x582   :  { %2359 = vmatprep.subr.mxu1 %v2692_v2  ;;  %2378 = vmatprep.subr.mxu0 %v2692_v2 }
 0x583   :  { %2360 = vmatpush3.msra.mxu1 %v2867_v35  ;;  %2379 = vmatpush3.msra.mxu0 %v2796_v8 }
 0x584   :  { %2361 = vmatprep.subr.mxu1 %v2692_v2  ;;  %2371 = vmatprep.mubr.msk.f32.mxu1 %vm2693_vm0, %v2692_v2 }
 0x585   :  { %2362 = vmatpush3.msra.mxu1 %v2874_v36  ;;  %2380 = vmatprep.subr.mxu0 %v2692_v2 }
 0x586   :  { %2363 = vmatprep.subr.mxu1 %v2692_v2  ;;  %2381 = vmatpush3.msra.mxu0 %v2806_v10 }
 0x587   :  { %2364 = vmatpush3.msra.mxu1 %v2881_v37  ;;  %2382 = vmatprep.mubr.msk.f32.mxu0 %vm2693_vm0, %v2692_v2 }
 0x588   :  { %2365 = vmatprep.subr.mxu1 %v2692_v2  ;;  %2385 = vmatprep.subr.mxu0 %v2692_v2 }
 0x589   :  { %2366 = vmatpush3.msra.mxu1 %v2888_v38 }
 0x58a   :  { %2367 = vmatprep.subr.mxu1 %v2692_v2 }
 0x58b   :  { %2368 = vmatpush3.msra.mxu1 %v2896_v40 }
 0x58c   :  { %2369 = vmatprep.subr.mxu1 %v2692_v2 }
 0x58d   :  { %2370 = vmatpush3.msra.mxu1 %v2905_v41 }
 0x58e   :  { %2404 = vmatprep.subr.mxu1 %v2692_v2 }
 0x63e   :  { %v556_v31 = vpop.f32.mrf.mxu0  ;;  %v655_v32 = vpop.f32.mrf.mxu1 }
 0x63f   :  { %v557_v39 = vadd.f32 %v2944_v46, %v556_v31  ;;  %v660_v42 = vrot.slane %v655_v32, 4 }
 0x640   :  { %v2343_v43 = vpop.f32.mrf.mxu0  ;;  %v2354_v44 = vpop.f32.mrf.mxu1 }
 0x641   :  { %2575 = vtanh.f32 %v557_v39  ;;  %v662_v45 = vadd.f32 %v660_v42, %v2844_v21  ;;  %v2099_v49 = vmul.f32 -1.442695, %v557_v39 }
 0x643   :  { %2577 = vtanh.f32 %v662_v45  ;;  %v2101_v50 = vmul.f32 -1.442695, %v662_v45 }
 0x644   :  { %2579 = vpow2.f32 %v2099_v49 }
 0x645   :  { %2581 = vpow2.f32 %v2101_v50 }
 0x64e   :  { %v2576_v47 = vpop.eup %2575 }
 0x64f   :  { %569 = vrot.lane.b32.xlu1 %v2576_v47, %s2694_s13 }
 0x650   :  { %v2578_v48 = vpop.eup %2577 }
 0x651   :  { %675 = vrot.lane.b32.xlu0 %v2578_v48, %s2694_s13  ;;  %v2580_v51 = vpop.eup %2579 }
 0x652   :  { %v2582_v52 = vpop.eup %2581  ;;  %v563_v53 = vadd.f32 1.0, %v2580_v51 }
 0x653   :  { %v666_v54 = vadd.f32 1.0, %v2582_v52 }
 0x654   :  { %2583 = vrcp.f32 %v563_v53 }
 0x655   :  { %2585 = vrcp.f32 %v666_v54 }
 0x661   :  { %v2584_v55 = vpop.eup %2583 }
 0x662   :  { %v2586_v58 = vpop.eup %2585  ;;  %v567_v61 = vmul.f32 %v2584_v55, %v2953_v13 }
 0x663   :  { %v673_v1 = vmul.f32 %v2586_v58, %v671_v62 }
 0x6c1   :  { %v570_v56 = vpop.permute.xlu1 %569 }
 0x6c2   :  { %v572_v57 = vmul.f32 %v2584_v55, %v570_v56 }
 0x6c3   :  { %v676_v59 = vpop.permute.xlu0 %675 }
 0x6c4   :  { %574 = vrot.lane.b32.xlu1 %v572_v57, %s2694_s13  ;;  %v678_v60 = vmul.f32 %v2586_v58, %v676_v59 }
 0x6c6   :  { %680 = vrot.lane.b32.xlu0 %v678_v60, %s2694_s13 }
 0x736   :  { %v575_v63 = vpop.permute.xlu1 %574 }
 0x737   :  { %v3006_v0 = vadd.f32 %v575_v63, %v567_v61 }
 0x738   :  { %v681_v3 = vpop.permute.xlu0 %680 }
 0x739   :  { %2587 = vtanh.f32 %v3006_v0  ;;  %v3009_v6 = vadd.f32 %v681_v3, %v673_v1 }
 0x73b   :  { %2589 = vtanh.f32 %v3009_v6 }
 0x746   :  { %v2588_v7 = vpop.eup %2587 }
 0x747   :  { %580 = vrot.lane.b32.xlu1 %v2588_v7, %s2694_s13 }
 0x748   :  { %v2590_v9 = vpop.eup %2589 }
 0x749   :  { %686 = vrot.lane.b32.xlu0 %v2590_v9, %s2694_s13 }
 0x7b9   :  { %v581_v11 = vpop.permute.xlu1 %580 }
 0x7ba   :  { %v3014_v12 = vmul.f32 %v2584_v55, %v581_v11  ;;  %v885_v55 = vrot.slane %v3009_v6, 6 }
 0x7bb   :  { %v687_v14 = vpop.permute.xlu0 %686 }
 0x7bc   :  { %v695_v13 = vrot.slane %v3014_v12, 4  ;;  %v689_v15 = vmul.f32 %v2586_v58, %v687_v14  ;;  %v1860_v63 = vrot.slane %v3014_v12, 6 }
 0x7be   :  { %696 = vrot.lane.b32.xlu0 %v695_v13, %s2696_s2  ;;  %691 = vrot.lane.b32.xlu1 %v689_v15, %s2695_s29  ;;  %v798_v16 = vrot.slane %v689_v15, 4  ;;  %v1874_v11 = vsel %vm1873_vm3, %v2961_v20, %v1860_v63 }
 0x7c2   :  { %799 = vrot.lane.b32.xlu1 %v798_v16, %s2695_s29 }
 0x830   :  { %v697_v17 = vpop.permute.xlu0 %696  ;;  %v692_v18 = vpop.permute.xlu1 %691 }
 0x831   :  { %v699_v22 = vsel %vm172_vm2, %v692_v18, %v697_v17 }
 0x832   :  { %v701_v23 = vrot.slane %v699_v22, 4 }
 0x834   :  { %v800_v24 = vpop.permute.xlu1 %799  ;;  %2372 = vmatmul.mubr.msk.f32.vlgmr.msra.gmra.mxu1 %vm90_vm1, %v701_v23 }
 0x835   :  { %2383 = vmatmul.mubr.msk.f32.vlgmr.msra.gmra.mxu0 %vm172_vm2, %v800_v24  ;;  %2405 = vmatpush3.msra.mxu1 %v2777_v4 }
 0x836   :  { %2386 = vmatpush3.msra.mxu0 %v2855_v33  ;;  %2406 = vmatprep.subr.mxu1 %v2692_v2 }
 0x837   :  { %2387 = vmatprep.subr.mxu0 %v2692_v2  ;;  %2407 = vmatpush3.msra.mxu1 %v2782_v5 }
 0x838   :  { %2388 = vmatpush3.msra.mxu0 %v2860_v34  ;;  %2408 = vmatprep.subr.mxu1 %v2692_v2 }
 0x839   :  { %2389 = vmatprep.subr.mxu0 %v2692_v2  ;;  %2409 = vmatpush3.msra.mxu1 %v2796_v8 }
 0x83a   :  { %2390 = vmatpush3.msra.mxu0 %v2867_v35  ;;  %2401 = vmatprep.mubr.msk.f32.mxu0 %vm2693_vm0, %v2692_v2 }
 0x83b   :  { %2391 = vmatprep.subr.mxu0 %v2692_v2  ;;  %2410 = vmatprep.subr.mxu1 %v2692_v2 }
 0x83c   :  { %2392 = vmatpush3.msra.mxu0 %v2874_v36  ;;  %2411 = vmatpush3.msra.mxu1 %v2806_v10 }
 0x83d   :  { %2393 = vmatprep.subr.mxu0 %v2692_v2  ;;  %2412 = vmatprep.mubr.msk.f32.mxu1 %vm2693_vm0, %v2692_v2 }
 0x83e   :  { %2394 = vmatpush3.msra.mxu0 %v2881_v37  ;;  %2415 = vmatprep.subr.mxu1 %v2692_v2 }
 0x83f   :  { %2395 = vmatprep.subr.mxu0 %v2692_v2 }
 0x840   :  { %2396 = vmatpush3.msra.mxu0 %v2888_v38 }
 0x841   :  { %2397 = vmatprep.subr.mxu0 %v2692_v2 }
 0x842   :  { %2398 = vmatpush3.msra.mxu0 %v2896_v40 }
 0x843   :  { %2399 = vmatprep.subr.mxu0 %v2692_v2 }
 0x844   :  { %2400 = vmatpush3.msra.mxu0 %v2905_v41 }
 0x845   :  { %2434 = vmatprep.subr.mxu0 %v2692_v2 }
 0x8f4   :  { %v770_v25 = vpop.f32.mrf.mxu1 }
 0x8f5   :  { %v771_v26 = vadd.f32 %v2944_v46, %v770_v25  ;;  %v869_v27 = vpop.f32.mrf.mxu0 }
 0x8f6   :  { %v874_v28 = vrot.slane %v869_v27, 2  ;;  %v2373_v29 = vpop.f32.mrf.mxu1 }
 0x8f7   :  { %2591 = vtanh.f32 %v771_v26  ;;  %v2384_v30 = vpop.f32.mrf.mxu0  ;;  %v2103_v42 = vmul.f32 -1.442695, %v771_v26 }
 0x8f8   :  { %v876_v31 = vadd.f32 %v874_v28, %v2844_v21 }
 0x8fa   :  { %2593 = vtanh.f32 %v876_v31  ;;  %v2105_v43 = vmul.f32 -1.442695, %v876_v31 }
 0x8fb   :  { %2595 = vpow2.f32 %v2103_v42 }
 0x8fc   :  { %2597 = vpow2.f32 %v2105_v43 }
 0x904   :  { %v2592_v32 = vpop.eup %2591 }
 0x905   :  { %783 = vrot.lane.b32.xlu0 %v2592_v32, %s2694_s13 }
 0x907   :  { %v2594_v39 = vpop.eup %2593 }
 0x908   :  { %889 = vrot.lane.b32.xlu1 %v2594_v39, %s2694_s13  ;;  %v2596_v44 = vpop.eup %2595 }
 0x909   :  { %v2598_v45 = vpop.eup %2597  ;;  %v777_v47 = vadd.f32 1.0, %v2596_v44 }
 0x90a   :  { %v880_v48 = vadd.f32 1.0, %v2598_v45 }
 0x90b   :  { %2599 = vrcp.f32 %v777_v47 }
 0x90c   :  { %2601 = vrcp.f32 %v880_v48 }
 0x918   :  { %v2600_v49 = vpop.eup %2599 }
 0x919   :  { %v2602_v51 = vpop.eup %2601  ;;  %v781_v54 = vmul.f32 %v2600_v49, %v3006_v0 }
 0x91a   :  { %v887_v58 = vmul.f32 %v2602_v51, %v885_v55 }
 0x977   :  { %v784_v50 = vpop.permute.xlu0 %783 }
 0x978   :  { %v786_v21 = vmul.f32 %v2600_v49, %v784_v50 }
 0x97a   :  { %v890_v52 = vpop.permute.xlu1 %889  ;;  %788 = vrot.lane.b32.xlu0 %v786_v21, %s2694_s13 }
 0x97b   :  { %v892_v53 = vmul.f32 %v2602_v51, %v890_v52 }
 0x97d   :  { %894 = vrot.lane.b32.xlu1 %v892_v53, %s2694_s13 }
 0x9ec   :  { %v789_v56 = vpop.permute.xlu0 %788 }
 0x9ed   :  { %v3059_v57 = vadd.f32 %v789_v56, %v781_v54 }
 0x9ef   :  { %2603 = vtanh.f32 %v3059_v57  ;;  %v895_v59 = vpop.permute.xlu1 %894 }
 0x9f0   :  { %v3062_v60 = vadd.f32 %v895_v59, %v887_v58 }
 0x9f2   :  { %2605 = vtanh.f32 %v3062_v60  ;;  %v1096_v50 = vrot.slane %v3062_v60, 6 }
 0x9fc   :  { %v2604_v61 = vpop.eup %2603 }
 0x9fd   :  { %794 = vrot.lane.b32.xlu0 %v2604_v61, %s2694_s13 }
 0x9ff   :  { %v2606_v62 = vpop.eup %2605 }
 0xa00   :  { %900 = vrot.lane.b32.xlu1 %v2606_v62, %s2694_s13 }
 0xa6f   :  { %v795_v0 = vpop.permute.xlu0 %794 }
 0xa70   :  { %v797_v1 = vmul.f32 %v2600_v49, %v795_v0 }
 0xa72   :  { %v909_v3 = vrot.slane %v797_v1, 2  ;;  %v1862_v6 = vrot.slane %v797_v1, 4  ;;  %v901_v7 = vpop.permute.xlu1 %900 }
 0xa73   :  { %v903_v9 = vmul.f32 %v2602_v51, %v901_v7 }
 0xa74   :  { %910 = vrot.lane.b32.xlu1 %v909_v3, %s2696_s2  ;;  %v3072_v13 = vsel %vm1875_vm4, %v1874_v11, %v1862_v6 }
 0xa75   :  { %905 = vrot.lane.b32.xlu0 %v903_v9, %s2695_s29  ;;  %v1012_v14 = vrot.slane %v903_v9, 6 }
 0xa79   :  { %1013 = vrot.lane.b32.xlu0 %v1012_v14, %s2695_s29 }
 0xae6   :  { %v911_v12 = vpop.permute.xlu1 %910 }
 0xae7   :  { %v906_v15 = vpop.permute.xlu0 %905 }
 0xae8   :  { %v913_v16 = vsel %vm172_vm2, %v906_v15, %v911_v12 }
 0xae9   :  { %v915_v17 = vrot.slane %v913_v16, 6 }
 0xaeb   :  { %2402 = vmatmul.mubr.msk.f32.vlgmr.msra.gmra.mxu0 %vm90_vm1, %v915_v17  ;;  %v1014_v18 = vpop.permute.xlu0 %1013 }
 0xaec   :  { %2413 = vmatmul.mubr.msk.f32.vlgmr.msra.gmra.mxu1 %vm172_vm2, %v1014_v18  ;;  %2435 = vmatpush3.msra.mxu0 %v2777_v4 }
 0xaed   :  { %2416 = vmatpush3.msra.mxu1 %v2855_v33  ;;  %2436 = vmatprep.subr.mxu0 %v2692_v2 }
 0xaee   :  { %2417 = vmatprep.subr.mxu1 %v2692_v2  ;;  %2437 = vmatpush3.msra.mxu0 %v2782_v5 }
 0xaef   :  { %2418 = vmatpush3.msra.mxu1 %v2860_v34  ;;  %2438 = vmatprep.subr.mxu0 %v2692_v2 }
 0xaf0   :  { %2419 = vmatprep.subr.mxu1 %v2692_v2  ;;  %2439 = vmatpush3.msra.mxu0 %v2796_v8 }
 0xaf1   :  { %2420 = vmatpush3.msra.mxu1 %v2867_v35  ;;  %2440 = vmatprep.subr.mxu0 %v2692_v2 }
 0xaf2   :  { %2421 = vmatprep.subr.mxu1 %v2692_v2  ;;  %2441 = vmatpush3.msra.mxu0 %v2806_v10 }
 0xaf3   :  { %2422 = vmatpush3.msra.mxu1 %v2874_v36  ;;  %2442 = vmatprep.mubr.msk.f32.mxu0 %vm2693_vm0, %v2692_v2 }
 0xaf4   :  { %2423 = vmatprep.subr.mxu1 %v2692_v2  ;;  %2431 = vmatprep.mubr.msk.f32.mxu1 %vm2693_vm0, %v2692_v2 }
 0xaf5   :  { %2424 = vmatpush3.msra.mxu1 %v2881_v37  ;;  %2445 = vmatprep.subr.mxu0 %v2692_v2 }
 0xaf6   :  { %2425 = vmatprep.subr.mxu1 %v2692_v2 }
 0xaf7   :  { %2426 = vmatpush3.msra.mxu1 %v2888_v38 }
 0xaf8   :  { %2427 = vmatprep.subr.mxu1 %v2692_v2 }
 0xaf9   :  { %2428 = vmatpush3.msra.mxu1 %v2896_v40 }
 0xafa   :  { %2429 = vmatprep.subr.mxu1 %v2692_v2 }
 0xafb   :  { %2430 = vmatpush3.msra.mxu1 %v2905_v41 }
 0xafc   :  { %2464 = vmatprep.subr.mxu1 %v2692_v2 }
 0xbab   :  { %v984_v20 = vpop.f32.mrf.mxu0 }
 0xbac   :  { %v985_v22 = vadd.f32 %v2944_v46, %v984_v20  ;;  %v1083_v23 = vpop.f32.mrf.mxu1 }
 0xbad   :  { %v1087_v24 = vadd.f32 %v1083_v23, %v2842_v19  ;;  %v2403_v25 = vpop.f32.mrf.mxu0 }
 0xbae   :  { %2607 = vtanh.f32 %v985_v22  ;;  %v2414_v26 = vpop.f32.mrf.mxu1  ;;  %v2107_v29 = vmul.f32 -1.442695, %v985_v22 }
 0xbaf   :  { %2609 = vtanh.f32 %v1087_v24  ;;  %v2109_v30 = vmul.f32 -1.442695, %v1087_v24 }
 0xbb0   :  { %2611 = vpow2.f32 %v2107_v29 }
 0xbb1   :  { %2613 = vpow2.f32 %v2109_v30 }
 0xbbb   :  { %v2608_v27 = vpop.eup %2607 }
 0xbbc   :  { %v2610_v28 = vpop.eup %2609  ;;  %997 = vrot.lane.b32.xlu1 %v2608_v27, %s2694_s13 }
 0xbbd   :  { %1100 = vrot.lane.b32.xlu0 %v2610_v28, %s2694_s13  ;;  %v2612_v31 = vpop.eup %2611 }
 0xbbe   :  { %v2614_v32 = vpop.eup %2613  ;;  %v991_v39 = vadd.f32 1.0, %v2612_v31 }
 0xbbf   :  { %v1091_v42 = vadd.f32 1.0, %v2614_v32 }
 0xbc0   :  { %2615 = vrcp.f32 %v991_v39 }
 0xbc1   :  { %2617 = vrcp.f32 %v1091_v42 }
 0xbcd   :  { %v2616_v43 = vpop.eup %2615 }
 0xbce   :  { %v2618_v45 = vpop.eup %2617  ;;  %v995_v21 = vmul.f32 %v2616_v43, %v3059_v57 }
 0xbcf   :  { %v1098_v52 = vmul.f32 %v2618_v45, %v1096_v50 }
 0xc2e   :  { %v998_v44 = vpop.permute.xlu1 %997 }
 0xc2f   :  { %v1000_v47 = vmul.f32 %v2616_v43, %v998_v44  ;;  %v1101_v48 = vpop.permute.xlu0 %1100 }
 0xc30   :  { %v1103_v49 = vmul.f32 %v2618_v45, %v1101_v48 }
 0xc31   :  { %1002 = vrot.lane.b32.xlu1 %v1000_v47, %s2694_s13 }
 0xc32   :  { %1105 = vrot.lane.b32.xlu0 %v1103_v49, %s2694_s13 }
 0xca3   :  { %v1003_v51 = vpop.permute.xlu1 %1002 }
 0xca4   :  { %v3115_v53 = vadd.f32 %v1003_v51, %v995_v21  ;;  %v1106_v54 = vpop.permute.xlu0 %1105 }
 0xca5   :  { %v3117_v55 = vadd.f32 %v1106_v54, %v1098_v52 }
 0xca6   :  { %2619 = vtanh.f32 %v3115_v53 }
 0xca7   :  { %2621 = vtanh.f32 %v3117_v55  ;;  %v1305_v27 = vrot.slane %v3117_v55, 6  ;;  %v2679_v55 = vld [vmem:[%s3361_s3 + $0x18] sm:$0xff] }
 0xcb3   :  { %v2620_v56 = vpop.eup %2619 }
 0xcb4   :  { %v2622_v58 = vpop.eup %2621  ;;  %1008 = vrot.lane.b32.xlu1 %v2620_v56, %s2694_s13  ;;  %v2680_v56 = vld [vmem:[%s3361_s3 + $0x10] sm:$0xff] }
 0xcb5   :  { %1111 = vrot.lane.b32.xlu0 %v2622_v58, %s2694_s13 }
 0xd26   :  { %v1009_v59 = vpop.permute.xlu1 %1008 }
 0xd27   :  { %v1011_v60 = vmul.f32 %v2616_v43, %v1009_v59  ;;  %v1112_v57 = vpop.permute.xlu0 %1111 }
 0xd28   :  { %v1114_v61 = vmul.f32 %v2618_v45, %v1112_v57 }
 0xd29   :  { %v1864_v62 = vrot.slane %v1011_v60, 2  ;;  %1120 = vrot.lane.b32.xlu0 %v1011_v60, %s2696_s2 }
 0xd2a   :  { %1116 = vrot.lane.b32.xlu1 %v1114_v61, %s2695_s29 }
 0xd2b   :  { %v3127_v63 = vsel %vm1877_vm5, %v3072_v13, %v1864_v62 }
 0xd9b   :  { %v1121_v0 = vpop.permute.xlu0 %1120 }
 0xd9c   :  { %v1117_v1 = vpop.permute.xlu1 %1116 }
 0xd9d   :  { %v1123_v3 = vsel %vm172_vm2, %v1117_v1, %v1121_v0  ;;  %2443 = vmatmul.mubr.msk.f32.vlgmr.msra.gmra.mxu0 %vm172_vm2, %v1117_v1 }
 0xd9e   :  { %2432 = vmatmul.mubr.msk.f32.vlgmr.msra.gmra.mxu1 %vm90_vm1, %v1123_v3  ;;  %2446 = vmatpush3.msra.mxu0 %v2855_v33 }
 0xd9f   :  { %2447 = vmatprep.subr.mxu0 %v2692_v2  ;;  %2465 = vmatpush3.msra.mxu1 %v2777_v4 }
 0xda0   :  { %2448 = vmatpush3.msra.mxu0 %v2860_v34  ;;  %2466 = vmatprep.subr.mxu1 %v2692_v2 }
 0xda1   :  { %2449 = vmatprep.subr.mxu0 %v2692_v2  ;;  %2467 = vmatpush3.msra.mxu1 %v2782_v5 }
 0xda2   :  { %2450 = vmatpush3.msra.mxu0 %v2867_v35  ;;  %2468 = vmatprep.subr.mxu1 %v2692_v2 }
 0xda3   :  { %2451 = vmatprep.subr.mxu0 %v2692_v2  ;;  %2469 = vmatpush3.msra.mxu1 %v2796_v8 }
 0xda4   :  { %2452 = vmatpush3.msra.mxu0 %v2874_v36  ;;  %2470 = vmatprep.subr.mxu1 %v2692_v2 }
 0xda5   :  { %2453 = vmatprep.subr.mxu0 %v2692_v2  ;;  %2461 = vmatprep.mubr.msk.f32.mxu0 %vm2693_vm0, %v2692_v2 }
 0xda6   :  { %2454 = vmatpush3.msra.mxu0 %v2881_v37  ;;  %2471 = vmatpush3.msra.mxu1 %v2806_v10 }
 0xda7   :  { %2455 = vmatprep.subr.mxu0 %v2692_v2  ;;  %2472 = vmatprep.mubr.msk.f32.mxu1 %vm2693_vm0, %v2692_v2 }
 0xda8   :  { %2456 = vmatpush3.msra.mxu0 %v2888_v38  ;;  %2475 = vmatprep.subr.mxu1 %v2692_v2 }
 0xda9   :  { %2457 = vmatprep.subr.mxu0 %v2692_v2 }
 0xdaa   :  { %2458 = vmatpush3.msra.mxu0 %v2896_v40 }
 0xdab   :  { %2459 = vmatprep.subr.mxu0 %v2692_v2 }
 0xdac   :  { %2460 = vmatpush3.msra.mxu0 %v2905_v41 }
 0xdad   :  { %2494 = vmatprep.subr.mxu0 %v2692_v2 }
 0xe5d   :  { %v1289_v4 = vpop.f32.mrf.mxu0 }
 0xe5e   :  { %v1294_v5 = vrot.slane %v1289_v4, 6  ;;  %v1193_v8 = vpop.f32.mrf.mxu1 }
 0xe5f   :  { %v1194_v10 = vadd.f32 %v2944_v46, %v1193_v8  ;;  %v2444_v6 = vpop.f32.mrf.mxu0 }
 0xe60   :  { %v1296_v7 = vadd.f32 %v1294_v5, %v2842_v19  ;;  %v2433_v9 = vpop.f32.mrf.mxu1 }
 0xe61   :  { %2623 = vtanh.f32 %v1194_v10  ;;  %v2111_v14 = vmul.f32 -1.442695, %v1194_v10 }
 0xe62   :  { %2625 = vtanh.f32 %v1296_v7  ;;  %v2113_v12 = vmul.f32 -1.442695, %v1296_v7 }
 0xe63   :  { %2627 = vpow2.f32 %v2111_v14 }
 0xe64   :  { %2629 = vpow2.f32 %v2113_v12 }
 0xe6e   :  { %v2624_v11 = vpop.eup %2623 }
 0xe6f   :  { %v2626_v13 = vpop.eup %2625  ;;  %1206 = vrot.lane.b32.xlu1 %v2624_v11, %s2694_s13 }
 0xe70   :  { %1309 = vrot.lane.b32.xlu0 %v2626_v13, %s2694_s13  ;;  %v2628_v15 = vpop.eup %2627 }
 0xe71   :  { %v2630_v16 = vpop.eup %2629  ;;  %v1200_v17 = vadd.f32 1.0, %v2628_v15 }
 0xe72   :  { %v1300_v18 = vadd.f32 1.0, %v2630_v16 }
 0xe73   :  { %2631 = vrcp.f32 %v1200_v17 }
 0xe74   :  { %2633 = vrcp.f32 %v1300_v18 }
 0xe80   :  { %v2632_v20 = vpop.eup %2631 }
 0xe81   :  { %v2634_v23 = vpop.eup %2633  ;;  %v1204_v28 = vmul.f32 %v2632_v20, %v3115_v53 }
 0xe82   :  { %v1307_v30 = vmul.f32 %v2634_v23, %v1305_v27 }
 0xee1   :  { %v1207_v22 = vpop.permute.xlu1 %1206 }
 0xee2   :  { %v1209_v24 = vmul.f32 %v2632_v20, %v1207_v22  ;;  %v1310_v25 = vpop.permute.xlu0 %1309 }
 0xee3   :  { %v1312_v26 = vmul.f32 %v2634_v23, %v1310_v25 }
 0xee4   :  { %1211 = vrot.lane.b32.xlu1 %v1209_v24, %s2694_s13 }
 0xee5   :  { %1314 = vrot.lane.b32.xlu0 %v1312_v26, %s2694_s13 }
 0xf56   :  { %v1212_v29 = vpop.permute.xlu1 %1211 }
 0xf57   :  { %v3168_v31 = vadd.f32 %v1212_v29, %v1204_v28  ;;  %v1315_v32 = vpop.permute.xlu0 %1314 }
 0xf58   :  { %v3170_v39 = vadd.f32 %v1315_v32, %v1307_v30  ;;  %v2683_v32 = vld [vmem:[%s3364_s5 + $0x38] sm:$0xff] }
 0xf59   :  { %2635 = vtanh.f32 %v3168_v31 }
 0xf5a   :  { %2637 = vtanh.f32 %v3170_v39  ;;  %v1519_v11 = vrot.slane %v3170_v39, 6  ;;  %v2684_v39 = vld [vmem:[%s3364_s5 + $0x30] sm:$0xff] }
 0xf66   :  { %v2636_v42 = vpop.eup %2635 }
 0xf67   :  { %v2638_v43 = vpop.eup %2637  ;;  %1217 = vrot.lane.b32.xlu1 %v2636_v42, %s2694_s13  ;;  %v2685_v42 = vld [vmem:[%s3364_s5 + $0x28] sm:$0xff] }
 0xf68   :  { %1320 = vrot.lane.b32.xlu0 %v2638_v43, %s2694_s13  ;;  %v2686_v43 = vld [vmem:[%s3364_s5 + $0x20] sm:$0xff] }
 0xfd9   :  { %v1218_v44 = vpop.permute.xlu1 %1217 }
 0xfda   :  { %v3176_v45 = vmul.f32 %v2632_v20, %v1218_v44  ;;  %v1321_v47 = vpop.permute.xlu0 %1320  ;;  %v2687_v44 = vld [vmem:[%s3364_s5 + $0x18] sm:$0xff] }
 0xfdb   :  { %v1323_v48 = vmul.f32 %v2634_v23, %v1321_v47  ;;  %v2688_v47 = vld [vmem:[%s3364_s5 + $0x10] sm:$0xff] }
 0xfdc   :  { %v1329_v49 = vrot.slane %v3176_v45, 6 }
 0xfdd   :  { %1325 = vrot.lane.b32.xlu1 %v1323_v48, %s2695_s29  ;;  %v1432_v50 = vrot.slane %v1323_v48, 2  ;;  %v2689_v48 = vld [vmem:[%s3364_s5 + $0x8] sm:$0xff] }
 0xfde   :  { %1330 = vrot.lane.b32.xlu0 %v1329_v49, %s2696_s2  ;;  %v2690_v49 = vld [vmem:[%s3364_s5] sm:$0xff] }
 0xfe1   :  { %1433 = vrot.lane.b32.xlu1 %v1432_v50, %s2695_s29 }
0x104f   :  { %v1326_v21 = vpop.permute.xlu1 %1325 }
0x1050   :  { %v1331_v51 = vpop.permute.xlu0 %1330 }
0x1051   :  { %v1333_v52 = vsel %vm172_vm2, %v1326_v21, %v1331_v51 }
0x1052   :  { %v1335_v53 = vrot.slane %v1333_v52, 2 }
0x1053   :  { %v1434_v54 = vpop.permute.xlu1 %1433 }
0x1054   :  { %2462 = vmatmul.mubr.msk.f32.vlgmr.msra.gmra.mxu0 %vm90_vm1, %v1335_v53  ;;  %2473 = vmatmul.mubr.msk.f32.vlgmr.msra.gmra.mxu1 %vm172_vm2, %v1434_v54 }
0x1055   :  { %2476 = vmatpush3.msra.mxu1 %v2855_v33  ;;  %2495 = vmatpush3.msra.mxu0 %v2679_v55  ;;  %v2681_v33 = vld [vmem:[%s3361_s3 + $0x8] sm:$0xff] }
0x1056   :  { %2477 = vmatprep.subr.mxu1 %v2692_v2  ;;  %2496 = vmatprep.subr.mxu0 %v2692_v2 }
0x1057   :  { %2478 = vmatpush3.msra.mxu1 %v2860_v34  ;;  %2497 = vmatpush3.msra.mxu0 %v2680_v56  ;;  %v2682_v34 = vld [vmem:[%s3361_s3] sm:$0xff] }
0x1058   :  { %2479 = vmatprep.subr.mxu1 %v2692_v2  ;;  %2498 = vmatprep.subr.mxu0 %v2692_v2 }
0x1059   :  { %2480 = vmatpush3.msra.mxu1 %v2867_v35  ;;  %2499 = vmatpush3.msra.mxu0 %v2681_v33 }
0x105a   :  { %2481 = vmatprep.subr.mxu1 %v2692_v2  ;;  %2491 = vmatprep.mubr.msk.f32.mxu1 %vm2693_vm0, %v2692_v2 }
0x105b   :  { %2482 = vmatpush3.msra.mxu1 %v2874_v36  ;;  %2500 = vmatprep.subr.mxu0 %v2692_v2 }
0x105c   :  { %2483 = vmatprep.subr.mxu1 %v2692_v2  ;;  %2501 = vmatpush3.msra.mxu0 %v2682_v34 }
0x105d   :  { %2484 = vmatpush3.msra.mxu1 %v2881_v37  ;;  %2502 = vmatprep.mubr.msk.f32.mxu0 %vm2693_vm0, %v2692_v2 }
0x105e   :  { %2485 = vmatprep.subr.mxu1 %v2692_v2  ;;  %2505 = vmatprep.subr.mxu0 %v2692_v2 }
0x105f   :  { %2486 = vmatpush3.msra.mxu1 %v2888_v38 }
0x1060   :  { %2487 = vmatprep.subr.mxu1 %v2692_v2 }
0x1061   :  { %2488 = vmatpush3.msra.mxu1 %v2896_v40 }
0x1062   :  { %2489 = vmatprep.subr.mxu1 %v2692_v2 }
0x1063   :  { %2490 = vmatpush3.msra.mxu1 %v2905_v41 }
0x1114   :  { %v1404_v35 = vpop.f32.mrf.mxu0  ;;  %v1503_v36 = vpop.f32.mrf.mxu1 }
0x1115   :  { %v1405_v37 = vadd.f32 %v2944_v46, %v1404_v35  ;;  %v1508_v58 = vrot.slane %v1503_v36, 4 }
0x1116   :  { %v2463_v59 = vpop.f32.mrf.mxu0  ;;  %v2474_v60 = vpop.f32.mrf.mxu1 }
0x1117   :  { %2639 = vtanh.f32 %v1405_v37  ;;  %v1510_v57 = vadd.f32 %v1508_v58, %v2842_v19  ;;  %v2115_v40 = vmul.f32 -1.442695, %v1405_v37 }
0x1119   :  { %2641 = vtanh.f32 %v1510_v57  ;;  %v2117_v62 = vmul.f32 -1.442695, %v1510_v57 }
0x111a   :  { %2643 = vpow2.f32 %v2115_v40 }
0x111b   :  { %2645 = vpow2.f32 %v2117_v62 }
0x1124   :  { %v2640_v38 = vpop.eup %2639 }
0x1125   :  { %1417 = vrot.lane.b32.xlu0 %v2640_v38, %s2694_s13 }
0x1126   :  { %v2642_v61 = vpop.eup %2641 }
0x1127   :  { %1523 = vrot.lane.b32.xlu1 %v2642_v61, %s2694_s13  ;;  %v2644_v41 = vpop.eup %2643 }
0x1128   :  { %v2646_v0 = vpop.eup %2645  ;;  %v1411_v1 = vadd.f32 1.0, %v2644_v41 }
0x1129   :  { %v1514_v3 = vadd.f32 1.0, %v2646_v0 }
0x112a   :  { %2647 = vrcp.f32 %v1411_v1 }
0x112b   :  { %2649 = vrcp.f32 %v1514_v3 }
0x1137   :  { %v2648_v4 = vpop.eup %2647 }
0x1138   :  { %v2650_v10 = vpop.eup %2649  ;;  %v1415_v9 = vmul.f32 %v2648_v4, %v3168_v31 }
0x1139   :  { %v1521_v12 = vmul.f32 %v2650_v10, %v1519_v11 }
0x1197   :  { %v1418_v5 = vpop.permute.xlu0 %1417 }
0x1198   :  { %v1420_v8 = vmul.f32 %v2648_v4, %v1418_v5 }
0x1199   :  { %v1524_v6 = vpop.permute.xlu1 %1523 }
0x119a   :  { %1422 = vrot.lane.b32.xlu0 %v1420_v8, %s2694_s13  ;;  %v1526_v7 = vmul.f32 %v2650_v10, %v1524_v6 }
0x119c   :  { %1528 = vrot.lane.b32.xlu1 %v1526_v7, %s2694_s13 }
0x120c   :  { %v1423_v13 = vpop.permute.xlu0 %1422 }
0x120d   :  { %v3228_v14 = vadd.f32 %v1423_v13, %v1415_v9 }
0x120e   :  { %v1529_v15 = vpop.permute.xlu1 %1528 }
0x120f   :  { %2651 = vtanh.f32 %v3228_v14  ;;  %v3231_v16 = vadd.f32 %v1529_v15, %v1521_v12 }
0x1211   :  { %2653 = vtanh.f32 %v3231_v16  ;;  %v1733_v40 = vrot.slane %v3231_v16, 6 }
0x121c   :  { %v2652_v17 = vpop.eup %2651 }
0x121d   :  { %1428 = vrot.lane.b32.xlu0 %v2652_v17, %s2694_s13 }
0x121e   :  { %v2654_v18 = vpop.eup %2653 }
0x121f   :  { %1534 = vrot.lane.b32.xlu1 %v2654_v18, %s2694_s13 }
0x128f   :  { %v1429_v20 = vpop.permute.xlu0 %1428 }
0x1290   :  { %v3236_v22 = vmul.f32 %v2648_v4, %v1429_v20 }
0x1291   :  { %v1535_v24 = vpop.permute.xlu1 %1534 }
0x1292   :  { %v1543_v23 = vrot.slane %v3236_v22, 4  ;;  %v1537_v25 = vmul.f32 %v2650_v10, %v1535_v24  ;;  %v1866_v8 = vrot.slane %v3236_v22, 6  ;;  %v2691_v22 = vld [vmem:[%s3365_s6] ss:$0 sm:$0xff]  ;;  %v78_v24 = vld [vmem:[%s3366_s8 + $0x18] sm:$0xff] }
0x1293   :  { %2524 = vmatprep.subr.mxu1 %v78_v24 }
0x1294   :  { %1544 = vrot.lane.b32.xlu1 %v1543_v23, %s2696_s2  ;;  %1539 = vrot.lane.b32.xlu0 %v1537_v25, %s2695_s29  ;;  %v1646_v26 = vrot.slane %v1537_v25, 4  ;;  %v77_v25 = vld [vmem:[%s3366_s8 + $0x10] sm:$0xff] }
0x1298   :  { %1647 = vrot.lane.b32.xlu0 %v1646_v26, %s2695_s29  ;;  %v76_v26 = vld [vmem:[%s3366_s8 + $0x8] sm:$0xff] }
0x1306   :  { %v1545_v27 = vpop.permute.xlu1 %1544  ;;  %v1540_v28 = vpop.permute.xlu0 %1539 }
0x1307   :  { %v1547_v29 = vsel %vm172_vm2, %v1540_v28, %v1545_v27 }
0x1308   :  { %v1549_v30 = vrot.slane %v1547_v29, 4 }
0x130a   :  { %v1648_v31 = vpop.permute.xlu0 %1647  ;;  %2492 = vmatmul.mubr.msk.f32.vlgmr.msra.gmra.mxu1 %vm90_vm1, %v1549_v30 }
0x130b   :  { %2503 = vmatmul.mubr.msk.f32.vlgmr.msra.gmra.mxu0 %vm172_vm2, %v1648_v31  ;;  %2525 = vmatpush3.msra.mxu1 %v78_v24  ;;  %v75_v31 = vld [vmem:[%s3366_s8] sm:$0xff] }
0x130c   :  { %2506 = vmatpush3.msra.mxu0 %v2683_v32  ;;  %2521 = vmatprep.mubr.msk.f32.mxu0 %vm2693_vm0, %v2692_v2  ;;  %v1882_v32 = vld [vmem:[%s3367_s1] sm:$0xff] }
0x130d   :  { %2507 = vmatprep.subr.mxu0 %v2692_v2  ;;  %2526 = vmatprep.subr.mxu1 %v77_v25 }
0x130e   :  { %2508 = vmatpush3.msra.mxu0 %v2684_v39  ;;  %2527 = vmatpush3.msra.mxu1 %v77_v25  ;;  %v1883_v39 = vld [vmem:[%s3367_s1 + $0x8] sm:$0xff] }
0x130f   :  { %2509 = vmatprep.subr.mxu0 %v2692_v2  ;;  %2528 = vmatprep.subr.mxu1 %v76_v26 }
0x1310   :  { %2510 = vmatpush3.msra.mxu0 %v2685_v42  ;;  %2529 = vmatpush3.msra.mxu1 %v76_v26 }
0x1311   :  { %2511 = vmatprep.subr.mxu0 %v2692_v2  ;;  %2530 = vmatprep.subr.mxu1 %v75_v31 }
0x1312   :  { %2512 = vmatpush3.msra.mxu0 %v2686_v43  ;;  %2531 = vmatpush3.msra.mxu1 %v75_v31 }
0x1313   :  { %2513 = vmatprep.subr.mxu0 %v2692_v2  ;;  %2532 = vmatprep.mubr.msk.f32.mxu1 %vm172_vm2, %v1882_v32 }
0x1314   :  { %2514 = vmatpush3.msra.mxu0 %v2687_v44  ;;  %2533 = vmatmul.mubr.msk.f32.vlgmr.msra.gmra.mxu1 %vm172_vm2, %v1883_v39 }
0x1315   :  { %2515 = vmatprep.subr.mxu0 %v2692_v2 }
0x1316   :  { %2516 = vmatpush3.msra.mxu0 %v2688_v47 }
0x1317   :  { %2517 = vmatprep.subr.mxu0 %v2692_v2 }
0x1318   :  { %2518 = vmatpush3.msra.mxu0 %v2689_v48 }
0x1319   :  { %2519 = vmatprep.subr.mxu0 %v2692_v2 }
0x131a   :  { %2520 = vmatpush3.msra.mxu0 %v2690_v49 }
0x13ca   :  { %v1618_v50 = vpop.f32.mrf.mxu1 }
0x13cb   :  { %v1619_v21 = vadd.f32 %v2944_v46, %v1618_v50  ;;  %v1717_v51 = vpop.f32.mrf.mxu0 }
0x13cc   :  { %v1722_v52 = vrot.slane %v1717_v51, 2  ;;  %v2493_v53 = vpop.f32.mrf.mxu1  ;;  %v73_v51 = vld [vmem:[%s3368_s7 + $0x10] sm:$0xff] }
0x13cd   :  { %2655 = vtanh.f32 %v1619_v21  ;;  %v2504_v54 = vpop.f32.mrf.mxu0  ;;  %v2119_v33 = vmul.f32 -1.442695, %v1619_v21  ;;  %v74_v21 = vld [vmem:[%s3368_s7 + $0x18] sm:$0xff] }
0x13ce   :  { %v1724_v55 = vadd.f32 %v1722_v52, %v2842_v19  ;;  %2535 = vmatprep.subr.mxu1 %v74_v21  ;;  %v71_v52 = vld [vmem:[%s3368_s7] sm:$0xff] }
0x13cf   :  { %2536 = vmatpush3.msra.mxu1 %v74_v21 }
0x13d0   :  { %2657 = vtanh.f32 %v1724_v55  ;;  %v2121_v34 = vmul.f32 -1.442695, %v1724_v55  ;;  %2537 = vmatprep.subr.mxu1 %v73_v51 }
0x13d1   :  { %2659 = vpow2.f32 %v2119_v33  ;;  %2538 = vmatpush3.msra.mxu1 %v73_v51 }
0x13d2   :  { %2661 = vpow2.f32 %v2121_v34  ;;  %v17_v34 = vstv %s3369_s11 }
0x13d3   :  { %18 = vst [vmem:[#allocation2] sm:$0x1] %v17_v34 }
0x13da   :  { %v2656_v56 = vpop.eup %2655 }
0x13db   :  { %1631 = vrot.lane.b32.xlu1 %v2656_v56, %s2694_s13 }
0x13dd   :  { %v2658_v2 = vpop.eup %2657 }
0x13de   :  { %1737 = vrot.lane.b32.xlu0 %v2658_v2, %s2694_s13  ;;  %v2660_v35 = vpop.eup %2659 }
0x13df   :  { %v2662_v46 = vpop.eup %2661  ;;  %v1625_v36 = vadd.f32 1.0, %v2660_v35  ;;  %v2534_v35 = vpop.f32.mrf.mxu1 }
0x13e0   :  { %v1728_v37 = vadd.f32 1.0, %v2662_v46 }
0x13e1   :  { %2663 = vrcp.f32 %v1625_v36  ;;  %v1956_v46 = vpop.f32.mrf.mxu1  ;;  %v2128_v36 = vld [vmem:[%s3370_s9] ss:$0 sm:$0xff] }
0x13e2   :  { %2665 = vrcp.f32 %v1728_v37 }
0x13ee   :  { %v2664_v58 = vpop.eup %2663 }
0x13ef   :  { %v2666_v60 = vpop.eup %2665  ;;  %v1629_v61 = vmul.f32 %v2664_v58, %v3228_v14  ;;  %v1879_v14 = vsel %vm1873_vm3, %v3176_v45, %v1866_v8 }
0x13f0   :  { %v1735_v0 = vmul.f32 %v2666_v60, %v1733_v40 }
0x144d   :  { %v1632_v59 = vpop.permute.xlu1 %1631 }
0x144e   :  { %v1634_v19 = vmul.f32 %v2664_v58, %v1632_v59 }
0x1450   :  { %v1738_v57 = vpop.permute.xlu0 %1737  ;;  %1636 = vrot.lane.b32.xlu1 %v1634_v19, %s2694_s13 }
0x1451   :  { %v1740_v38 = vmul.f32 %v2666_v60, %v1738_v57  ;;  %v2129_v57 = vld [vmem:[%s3371_s10] ss:$0 sm:$0xff] }
0x1453   :  { %1742 = vrot.lane.b32.xlu0 %v1740_v38, %s2694_s13 }
0x14c2   :  { %v1637_v62 = vpop.permute.xlu1 %1636 }
0x14c3   :  { %v1639_v41 = vadd.f32 %v1637_v62, %v1629_v61 }
0x14c5   :  { %2667 = vtanh.f32 %v1639_v41  ;;  %v1743_v1 = vpop.permute.xlu0 %1742 }
0x14c6   :  { %v1745_v3 = vadd.f32 %v1743_v1, %v1735_v0 }
0x14c8   :  { %2669 = vtanh.f32 %v1745_v3  ;;  %v2130_v3 = vld [vmem:[#allocation2] ss:$0 sm:$0xff] }
0x14d2   :  { %v2668_v4 = vpop.eup %2667 }
0x14d3   :  { %1642 = vrot.lane.b32.xlu1 %v2668_v4, %s2694_s13 }
0x14d5   :  { %v2670_v5 = vpop.eup %2669 }
0x14d6   :  { %1748 = vrot.lane.b32.xlu0 %v2670_v5, %s2694_s13 }
0x1545   :  { %v1643_v10 = vpop.permute.xlu1 %1642 }
0x1546   :  { %v1645_v6 = vmul.f32 %v2664_v58, %v1643_v10 }
0x1548   :  { %v1757_v7 = vrot.slane %v1645_v6, 2  ;;  %v1868_v9 = vrot.slane %v1645_v6, 4  ;;  %v1749_v11 = vpop.permute.xlu0 %1748 }
0x1549   :  { %v1751_v13 = vmul.f32 %v2666_v60, %v1749_v11 }
0x154a   :  { %1758 = vrot.lane.b32.xlu0 %v1757_v7, %s2696_s2  ;;  %v3293_v12 = vsel %vm1875_vm4, %v1879_v14, %v1868_v9 }
0x154b   :  { %1753 = vrot.lane.b32.xlu1 %v1751_v13, %s2695_s29 }
0x15bc   :  { %v1759_v15 = vpop.permute.xlu0 %1758 }
0x15bd   :  { %v1754_v16 = vpop.permute.xlu1 %1753 }
0x15be   :  { %v1761_v17 = vsel %vm172_vm2, %v1754_v16, %v1759_v15 }
0x15bf   :  { %v1763_v18 = vrot.slane %v1761_v17, 6 }
0x15c1   :  { %2522 = vmatmul.mubr.msk.f32.vlgmr.msra.gmra.mxu0 %vm90_vm1, %v1763_v18 }
0x1681   :  { %v1832_v20 = vpop.f32.mrf.mxu0 }
0x1682   :  { %v1833_v45 = vadd.f32 %v2691_v22, %v1832_v20 }
0x1683   :  { %v2523_v23 = vpop.f32.mrf.mxu0 }
0x1684   :  { %2671 = vtanh.f32 %v1833_v45  ;;  %v2123_v28 = vmul.f32 -1.442695, %v1833_v45 }
0x1686   :  { %2673 = vpow2.f32 %v2123_v28 }
0x1691   :  { %v2672_v27 = vpop.eup %2671 }
0x1692   :  { %1845 = vrot.lane.b32.xlu1 %v2672_v27, %s2694_s13 }
0x1693   :  { %v2674_v29 = vpop.eup %2673 }
0x1694   :  { %v1839_v30 = vadd.f32 1.0, %v2674_v29 }
0x1696   :  { %2675 = vrcp.f32 %v1839_v30 }
0x16a3   :  { %v2676_v42 = vpop.eup %2675 }
0x16a4   :  { %v1843_v47 = vmul.f32 %v2676_v42, %v1639_v41 }
0x1704   :  { %v1846_v43 = vpop.permute.xlu1 %1845 }
0x1705   :  { %v1848_v44 = vmul.f32 %v2676_v42, %v1846_v43 }
0x1707   :  { %1850 = vrot.lane.b32.xlu0 %v1848_v44, %s2694_s13 }
0x170b   :  { %1967 = vrot.lane.b32.xlu0 %v3127_v63, %s2695_s29  ;;  %v72_v63 = vld [vmem:[%s3368_s7 + $0x8] sm:$0xff] }
0x170c   :  { %2539 = vmatprep.subr.mxu1 %v72_v63 }
0x170d   :  { %2540 = vmatpush3.msra.mxu1 %v72_v63 }
0x170e   :  { %2541 = vmatprep.subr.mxu1 %v71_v52 }
0x170f   :  { %2542 = vmatpush3.msra.mxu1 %v71_v52 }
0x1779   :  { %v1851_v48 = vpop.permute.xlu0 %1850 }
0x177a   :  { %v1853_v49 = vadd.f32 %v1851_v48, %v1843_v47 }
0x177c   :  { %2677 = vtanh.f32 %v1853_v49 }
0x177d   :  { %v1968_v50 = vpop.permute.xlu0 %1967 }
0x177e   :  { %2543 = vmatprep.mubr.msk.f32.mxu1 %vm172_vm2, %v1968_v50 }
0x1789   :  { %v2678_v53 = vpop.eup %2677 }
0x178a   :  { %1856 = vrot.lane.b32.xlu1 %v2678_v53, %s2694_s13 }
0x17fc   :  { %v1857_v54 = vpop.permute.xlu1 %1856 }
0x17fd   :  { %v1859_v55 = vmul.f32 %v2676_v42, %v1857_v54 }
0x17ff   :  { %v1871_v56 = vrot.slane %v1859_v55, 2 }
0x1801   :  { %v1881_v2 = vsel %vm1877_vm5, %v3293_v12, %v1871_v56 }
0x1802   :  { %1969 = vrot.lane.b32.xlu1 %v1881_v2, %s2695_s29 }
0x1874   :  { %v1970_v33 = vpop.permute.xlu1 %1969 }
0x1875   :  { %2544 = vmatmul.mubr.msk.f32.vlgmr.msra.gmra.mxu1 %vm172_vm2, %v1970_v33 }
0x1935   :  { %v2545_v37 = vpop.f32.mrf.mxu1 }
0x1936   :  { %v2047_v58 = vadd.f32 %v2545_v37, %v2534_v35 }
0x1937   :  { %v2041_v59 = vpop.f32.mrf.mxu1 }
0x1938   :  { %v2057_v19 = vadd.f32 %v2128_v36, %v2047_v58  ;;  %v2042_v60 = vadd.f32 %v2041_v59, %v1956_v46 }
0x193a   :  { %v2059_v38 = vmax.f32 %v2057_v19, 0.0  ;;  %v2056_v61 = vadd.f32 %v2128_v36, %v2042_v60 }
0x193c   :  { %v2058_v40 = vmax.f32 %v2056_v61, 0.0  ;;  %v2067_v62 = vmul.f32 %v2129_v57, %v2059_v38 }
0x193e   :  { %v2071_v41 = vsel %vm172_vm2, %v2067_v62, 0.0  ;;  %v2066_v0 = vmul.f32 %v2129_v57, %v2058_v40 }
0x193f   :  { %2072 = vadd.xlane.f32.xlu1 %v2071_v41 }
0x1940   :  { %v2068_v1 = vsel %vm172_vm2, %v2066_v0, 0.0 }
0x1941   :  { %2069 = vadd.xlane.f32.xlu0 %v2068_v1 }
0x19c8   :  { %v2073_v4 = vpop.xlane.xlu1 %2072 }
0x19c9   :  { %v2081_v5 = vadd.f32 %v2130_v3, %v2073_v4 }
0x19ca   :  { %v2070_v8 = vpop.xlane.xlu0 %2069 }
0x19cb   :  { %2084 = vst.msk [vmem:[%s3372_s12 + $0x8] sm:$0xff] %vm2082_vm6, %v2081_v5  ;;  %v2080_v10 = vadd.f32 %v2130_v3, %v2070_v8 }
0x19cd   :  { %2083 = vst.msk [vmem:[%s3372_s12] sm:$0xff] %vm2082_vm6, %v2080_v10 }

</bundles_post_ra>
